<compile_context>
chip_gen: v7x
topology: tpu7x:2x2x1
jax: 0.10.0
libtpu: 0.0.40
codegen_flags: <defaults>
</compile_context>

<pallas_src>
import functools

import jax
import jax.numpy as jnp
import numpy as np
from jax.experimental import pallas as pl
from jax.experimental.pallas import tpu as pltpu


def _round_up(x, m):
    return ((x + m - 1) // m) * m


def _make_kernel(filter_sizes, f_pad, seq_len, b_tile, emb_dim, vocab):
    num_convs = len(filter_sizes)
    max_fs = max(filter_sizes)
    n_rows = b_tile * seq_len
    pad_rows = max_fs - 1

    def kernel(ids_ref, tbl_ref, wconv_ref, bconv_ref, wfc_ref, bfc_ref,
               out_ref):
        # ---- Embedding "gather": one-hot matmul against the VMEM-resident
        # table (exact for bf16 table values; f32 accumulation). ----
        ids = ids_ref[...]                                   # [N, 1] int32
        iota_v = jax.lax.broadcasted_iota(jnp.int32, (n_rows, vocab), 1)
        oh = jnp.where(ids == iota_v, 1.0, 0.0).astype(jnp.bfloat16)
        emb = jnp.dot(oh, tbl_ref[...],
                      preferred_element_type=jnp.float32)   # [N, E] f32
        emb = emb.astype(jnp.bfloat16)

        # ---- Build the im2col window ONCE for max_fs. ----
        if pad_rows > 0:
            embp = jnp.concatenate(
                [emb, jnp.zeros((pad_rows, emb_dim), jnp.bfloat16)], axis=0)
        else:
            embp = emb
        window = jnp.concatenate(
            [embp[k:k + n_rows, :] for k in range(max_fs)], axis=-1)

        # ---- ONE fused conv matmul for all filter sizes. ----
        # [N, max_fs*E] @ [max_fs*E, num_convs*Fp]  (f32 accumulation)
        conv = jnp.dot(window, wconv_ref[...],
                       preferred_element_type=jnp.float32) + bconv_ref[...]
        conv = jnp.maximum(conv, 0.0)                        # ReLU (f32)

        # Mask windows that cross a batch boundary, per 128-lane column block:
        # for filter size fs the valid local positions are l <= S - fs.
        # ReLU >= 0, so masking to 0 leaves the max-over-time unchanged.
        row_l = jax.lax.broadcasted_iota(jnp.int32, (n_rows, 1), 0) % seq_len
        limit = jnp.concatenate(
            [jnp.full((1, f_pad), seq_len - fs, jnp.int32)
             for fs in filter_sizes], axis=-1)               # [1, C*Fp] const
        conv = jnp.where(row_l <= limit, conv, 0.0)

        # Max-pool over time per batch element.
        conv = conv.reshape(b_tile, seq_len, num_convs * f_pad)
        pooled = jnp.max(conv, axis=1)                       # [Bt, C*Fp] f32

        # Final linear layer (dropout = identity in eval mode).
        logits = jnp.dot(pooled.astype(jnp.bfloat16), wfc_ref[...],
                         preferred_element_type=jnp.float32) + bfc_ref[...]
        out_ref[...] = logits.astype(out_ref.dtype)

    return kernel


@functools.partial(jax.jit,
                   static_argnames=("filter_sizes", "output_dim", "b_tile"))
def cnn_forward(x_sb, emb_table, conv_ws, conv_bs, fc_w, fc_b,
                filter_sizes, output_dim, b_tile=8):
    """x_sb: [S, B] int token ids (PyTorch layout). Returns [B, output_dim] f32."""
    S, B = x_sb.shape
    V, E = emb_table.shape
    F = conv_ws[0].shape[-1]
    C = len(filter_sizes)
    max_fs = max(filter_sizes)
    assert S >= max_fs, "sequence must be at least as long as the largest filter"

    LANE = 128
    Fp = _round_up(F, LANE)             # lane-pad filter count
    OutP = _round_up(output_dim, LANE)  # lane-pad output dim
    Bt = min(b_tile, B)
    B_pad = _round_up(B, Bt)

    # Token ids: [S, B] -> [B_pad*S, 1] (one flattened (b, s) row per sublane;
    # regular per-tile VMEM block, no scalar prefetch needed).
    ids = x_sb.astype(jnp.int32).T                      # [B, S]
    if B_pad != B:
        ids = jnp.pad(ids, ((0, B_pad - B), (0, 0)))
    ids = ids.reshape(B_pad * S, 1)

    # Embedding table stays VMEM-resident for the whole kernel (small vocab).
    tbl = emb_table.astype(jnp.bfloat16)                # [V, E] bf16

    # Fused conv weights: tap k of conv c lives at rows [k*E, (k+1)*E),
    # columns [c*Fp, c*Fp + F); unused taps / lane padding stay zero.
    wconv = jnp.zeros((max_fs * E, C * Fp), jnp.float32)
    bconv = jnp.zeros((1, C * Fp), jnp.float32)
    for c, (w, b) in enumerate(zip(conv_ws, conv_bs)):  # w: [fs, E, F], b: [1, F]
        fs = w.shape[0]
        wconv = wconv.at[:fs * E, c * Fp:c * Fp + F].set(w.reshape(fs * E, F))
        bconv = bconv.at[:, c * Fp:c * Fp + F].set(b.reshape(1, F))
    wconv = wconv.astype(jnp.bfloat16)

    # FC weight re-laid out for the lane-padded pooled concat, bf16 operand.
    wfc = jnp.zeros((C * Fp, OutP), jnp.float32)
    for c in range(C):
        wfc = wfc.at[c * Fp:c * Fp + F, :output_dim].set(
            fc_w[c * F:(c + 1) * F, :])
    wfc = wfc.astype(jnp.bfloat16)
    bfc = jnp.pad(fc_b.reshape(1, output_dim),
                  ((0, 0), (0, OutP - output_dim))).astype(jnp.float32)

    def _const(shape):
        # Constant block index -> DMA'd once, resident across all grid steps.
        return pl.BlockSpec(shape, lambda b: (0, 0))

    grid_spec = pltpu.PrefetchScalarGridSpec(
        num_scalar_prefetch=0,
        grid=(B_pad // Bt,),
        in_specs=[
            pl.BlockSpec((Bt * S, 1), lambda b: (b, 0)),   # token ids per tile
            _const((V, E)),                                # embedding table
            _const((max_fs * E, C * Fp)),                  # fused conv weights
            _const((1, C * Fp)),                           # fused conv biases
            _const((C * Fp, OutP)),                        # fc weight
            _const((1, OutP)),                             # fc bias
        ],
        out_specs=pl.BlockSpec((Bt, OutP), lambda b: (b, 0)),
    )

    out = pl.pallas_call(
        _make_kernel(tuple(filter_sizes), Fp, S, Bt, E, V),
        out_shape=jax.ShapeDtypeStruct((B_pad, OutP), jnp.float32),
        grid_spec=grid_spec,
        compiler_params=pltpu.CompilerParams(
            dimension_semantics=("parallel",)),
    )(ids, tbl, wconv, bconv, wfc, bfc)

    return out[:B, :output_dim]


def _reference(x_sb, emb_table, conv_ws, conv_bs, fc_w, fc_b):
    """Pure-JAX f32 reference mirroring the PyTorch forward (eval mode)."""
    ids = jnp.transpose(x_sb, (1, 0))
    emb = emb_table[ids]                                  # [B, S, E]
    pooled = []
    for w, b in zip(conv_ws, conv_bs):                    # w: [fs, E, F]
        fs = w.shape[0]
        L = emb.shape[1] - fs + 1
        acc = b.reshape(1, 1, -1)
        for k in range(fs):
            acc = acc + jnp.einsum("ble,ef->blf", emb[:, k:k + L, :], w[k])
        pooled.append(jnp.max(jnp.maximum(acc, 0.0), axis=1))
    cat = jnp.concatenate(pooled, axis=-1)
    return cat @ fc_w + fc_b


if __name__ == "__main__":
    # Small, forward-consistent hyperparameters.
    vocab_size = 64
    embedding_dim = 32
    n_filters = 8
    filter_sizes = (3, 4, 5)
    output_dim = 4
    seq_len = 16
    batch = 16                      # 2 batch tiles of 8 -> exercises the grid

    key = jax.random.PRNGKey(0)
    keys = jax.random.split(key, 3 + 2 * len(filter_sizes))

    # Deterministic synthetic parameters (shapes match nn.Module __init__).
    emb_table = jax.random.normal(keys[0], (vocab_size, embedding_dim),
                                  jnp.float32) * 0.1
    conv_ws, conv_bs = [], []
    for i, fs in enumerate(filter_sizes):
        # PyTorch Conv2d weight [F, 1, fs, E]  ->  kernel layout [fs, E, F]
        w = jax.random.normal(keys[1 + i], (fs, embedding_dim, n_filters),
                              jnp.float32) * 0.1
        conv_ws.append(w)
        conv_bs.append(jnp.full((1, n_filters), 0.01, jnp.float32))
    # PyTorch Linear weight [out, in]  ->  kernel layout [in, out]
    fc_w = jax.random.normal(keys[1 + len(filter_sizes)],
                             (len(filter_sizes) * n_filters, output_dim),
                             jnp.float32) * 0.1
    fc_b = jnp.full((1, output_dim), 0.02, jnp.float32)

    # Input token ids in PyTorch layout [seq_len, batch].
    x = jax.random.randint(keys[-1], (seq_len, batch), 0, vocab_size, jnp.int32)

    out = cnn_forward(x, emb_table, conv_ws, conv_bs, fc_w, fc_b,
                      filter_sizes, output_dim)
    out = jax.block_until_ready(out)

    ref = _reference(x, emb_table, conv_ws, conv_bs, fc_w, fc_b)
    # bf16 matmul operands (f32 accumulation) -> relaxed tolerance vs f32 ref.
    np.testing.assert_allclose(np.asarray(out), np.asarray(ref),
                               rtol=2e-2, atol=1e-2)
    assert out.shape == (batch, output_dim)
    print("KERNEL_OK")
</pallas_src>

<mosaic_0001>
module attributes {stable_mosaic.version = 11 : i64} {
  func.func @kernel(%arg0: i32, %arg1: memref<128x1xi32, #tpu.memory_space<vmem>>, %arg2: memref<64x32xbf16, #tpu.memory_space<vmem>>, %arg3: memref<160x384xbf16, #tpu.memory_space<vmem>>, %arg4: memref<1x384xf32, #tpu.memory_space<vmem>>, %arg5: memref<384x128xbf16, #tpu.memory_space<vmem>>, %arg6: memref<1x128xf32, #tpu.memory_space<vmem>>, %arg7: memref<8x128xf32, #tpu.memory_space<vmem>>) attributes {dimension_semantics = [#tpu.dimension_semantics<parallel>], iteration_bounds = array<i64: 2>, scalar_prefetch = 0 : i64, scratch_operands = 0 : i64, tpu.core_type = #tpu.core_type<tc>, window_params = [{transform_indices = @transform_0, window_bounds = array<i64: 128, 1>}, {pipeline_mode = #tpu.pipeline_mode<synchronous>, transform_indices = @transform_1, window_bounds = array<i64: 64, 32>}, {pipeline_mode = #tpu.pipeline_mode<synchronous>, transform_indices = @transform_2, window_bounds = array<i64: 160, 384>}, {pipeline_mode = #tpu.pipeline_mode<synchronous>, transform_indices = @transform_3, window_bounds = array<i64: 1, 384>}, {pipeline_mode = #tpu.pipeline_mode<synchronous>, transform_indices = @transform_4, window_bounds = array<i64: 384, 128>}, {pipeline_mode = #tpu.pipeline_mode<synchronous>, transform_indices = @transform_5, window_bounds = array<i64: 1, 128>}, {transform_indices = @transform_6, window_bounds = array<i64: 8, 128>}]} {
    %c0 = arith.constant 0 : index
    %c0_0 = arith.constant 0 : index
    %0 = vector.load %arg1[%c0, %c0_0] : memref<128x1xi32, #tpu.memory_space<vmem>>, vector<128x1xi32>
    %1 = tpu.iota {dimensions = array<i32: 1>} : vector<128x64xi32>
    %2 = vector.broadcast %0 : vector<128x1xi32> to vector<128x64xi32>
    %3 = arith.cmpi eq, %2, %1 : vector<128x64xi32>
    %cst = arith.constant 1.000000e+00 : f32
    %cst_1 = arith.constant 0.000000e+00 : f32
    %4 = vector.broadcast %cst : f32 to vector<128x64xf32>
    %5 = vector.broadcast %cst_1 : f32 to vector<128x64xf32>
    %6 = arith.select %3, %4, %5 : vector<128x64xi1>, vector<128x64xf32>
    %7 = arith.truncf %6 : vector<128x64xf32> to vector<128x64xbf16>
    %c0_2 = arith.constant 0 : index
    %c0_3 = arith.constant 0 : index
    %8 = vector.load %arg2[%c0_2, %c0_3] : memref<64x32xbf16, #tpu.memory_space<vmem>>, vector<64x32xbf16>
    %cst_4 = arith.constant dense<0.000000e+00> : vector<128x32xf32>
    %9 = tpu.matmul %7, %8, %cst_4 {dimension_numbers = #tpu.dot_dimension_numbers<[1], [0], [0], [1], [0, 0, 1, 1], [], []>} : vector<128x64xbf16>, vector<64x32xbf16>, vector<128x32xf32> -> vector<128x32xf32>
    %10 = arith.truncf %9 : vector<128x32xf32> to vector<128x32xbf16>
    %cst_5 = arith.constant 0.000000e+00 : bf16
    %11 = vector.broadcast %cst_5 : bf16 to vector<4x32xbf16>
    %12 = tpu.concatenate %10, %11 in 0 : vector<128x32xbf16>, vector<4x32xbf16> -> vector<132x32xbf16>
    %13 = vector.extract_strided_slice %12 {offsets = [0, 0], sizes = [128, 32], strides = [1, 1]} : vector<132x32xbf16> to vector<128x32xbf16>
    %14 = vector.extract_strided_slice %12 {offsets = [1, 0], sizes = [128, 32], strides = [1, 1]} : vector<132x32xbf16> to vector<128x32xbf16>
    %15 = vector.extract_strided_slice %12 {offsets = [2, 0], sizes = [128, 32], strides = [1, 1]} : vector<132x32xbf16> to vector<128x32xbf16>
    %16 = vector.extract_strided_slice %12 {offsets = [3, 0], sizes = [128, 32], strides = [1, 1]} : vector<132x32xbf16> to vector<128x32xbf16>
    %17 = vector.extract_strided_slice %12 {offsets = [4, 0], sizes = [128, 32], strides = [1, 1]} : vector<132x32xbf16> to vector<128x32xbf16>
    %18 = tpu.concatenate %13, %14, %15, %16, %17 in 1 : vector<128x32xbf16>, vector<128x32xbf16>, vector<128x32xbf16>, vector<128x32xbf16>, vector<128x32xbf16> -> vector<128x160xbf16>
    %c0_6 = arith.constant 0 : index
    %c0_7 = arith.constant 0 : index
    %19 = vector.load %arg3[%c0_6, %c0_7] : memref<160x384xbf16, #tpu.memory_space<vmem>>, vector<160x384xbf16>
    %cst_8 = arith.constant dense<0.000000e+00> : vector<128x384xf32>
    %20 = tpu.matmul %18, %19, %cst_8 {dimension_numbers = #tpu.dot_dimension_numbers<[1], [0], [0], [1], [0, 0, 1, 1], [], []>} : vector<128x160xbf16>, vector<160x384xbf16>, vector<128x384xf32> -> vector<128x384xf32>
    %c0_9 = arith.constant 0 : index
    %c0_10 = arith.constant 0 : index
    %21 = vector.load %arg4[%c0_9, %c0_10] : memref<1x384xf32, #tpu.memory_space<vmem>>, vector<1x384xf32>
    %22 = vector.broadcast %21 : vector<1x384xf32> to vector<128x384xf32>
    %23 = arith.addf %20, %22 : vector<128x384xf32>
    %cst_11 = arith.constant 0.000000e+00 : f32
    %24 = vector.broadcast %cst_11 : f32 to vector<128x384xf32>
    %25 = arith.maximumf %23, %24 : vector<128x384xf32>
    %26 = tpu.iota {dimensions = array<i32: 0>} : vector<128x1xi32>
    %c16_i32 = arith.constant 16 : i32
    %c0_i32 = arith.constant 0 : i32
    %27 = arith.cmpi eq, %c16_i32, %c0_i32 : i32
    %c1_i32 = arith.constant 1 : i32
    %28 = arith.select %27, %c1_i32, %c16_i32 : i32
    %29 = vector.broadcast %28 : i32 to vector<128x1xi32>
    %30 = arith.remsi %26, %29 : vector<128x1xi32>
    %c0_i32_12 = arith.constant 0 : i32
    %31 = vector.broadcast %c0_i32_12 : i32 to vector<128x1xi32>
    %32 = arith.cmpi ne, %30, %31 : vector<128x1xi32>
    %c0_i32_13 = arith.constant 0 : i32
    %33 = vector.broadcast %c0_i32_13 : i32 to vector<128x1xi32>
    %34 = arith.cmpi slt, %30, %33 : vector<128x1xi32>
    %c0_i32_14 = arith.constant 0 : i32
    %35 = arith.cmpi slt, %28, %c0_i32_14 : i32
    %36 = vector.broadcast %35 : i1 to vector<128x1xi1>
    %37 = vector.broadcast %36 : vector<128x1xi1> to vector<128x1xi1>
    %38 = arith.xori %34, %37 : vector<128x1xi1>
    %39 = arith.andi %38, %32 : vector<128x1xi1>
    %40 = vector.broadcast %28 : i32 to vector<128x1xi32>
    %41 = arith.addi %30, %40 : vector<128x1xi32>
    %42 = arith.select %39, %41, %30 : vector<128x1xi1>, vector<128x1xi32>
    %c13_i32 = arith.constant 13 : i32
    %43 = vector.broadcast %c13_i32 : i32 to vector<1x128xi32>
    %c12_i32 = arith.constant 12 : i32
    %44 = vector.broadcast %c12_i32 : i32 to vector<1x128xi32>
    %c11_i32 = arith.constant 11 : i32
    %45 = vector.broadcast %c11_i32 : i32 to vector<1x128xi32>
    %46 = tpu.concatenate %43, %44, %45 in 1 : vector<1x128xi32>, vector<1x128xi32>, vector<1x128xi32> -> vector<1x384xi32>
    %47 = vector.broadcast %42 : vector<128x1xi32> to vector<128x384xi32>
    %48 = vector.broadcast %46 : vector<1x384xi32> to vector<128x384xi32>
    %49 = arith.cmpi sle, %47, %48 : vector<128x384xi32>
    %cst_15 = arith.constant 0.000000e+00 : f32
    %50 = vector.broadcast %cst_15 : f32 to vector<128x384xf32>
    %51 = arith.select %49, %25, %50 : vector<128x384xi1>, vector<128x384xf32>
    %52 = vector.shape_cast %51 : vector<128x384xf32> to vector<8x16x384xf32>
    %cst_16 = arith.constant dense<0xFF800000> : vector<8x384xf32>
    %53 = vector.multi_reduction <maximumf>, %52, %cst_16 [1] : vector<8x16x384xf32> to vector<8x384xf32>
    %54 = arith.truncf %53 : vector<8x384xf32> to vector<8x384xbf16>
    %c0_17 = arith.constant 0 : index
    %c0_18 = arith.constant 0 : index
    %55 = vector.load %arg5[%c0_17, %c0_18] : memref<384x128xbf16, #tpu.memory_space<vmem>>, vector<384x128xbf16>
    %cst_19 = arith.constant dense<0.000000e+00> : vector<8x128xf32>
    %56 = tpu.matmul %54, %55, %cst_19 {dimension_numbers = #tpu.dot_dimension_numbers<[1], [0], [0], [1], [0, 0, 1, 1], [], []>} : vector<8x384xbf16>, vector<384x128xbf16>, vector<8x128xf32> -> vector<8x128xf32>
    %c0_20 = arith.constant 0 : index
    %c0_21 = arith.constant 0 : index
    %57 = vector.load %arg6[%c0_20, %c0_21] : memref<1x128xf32, #tpu.memory_space<vmem>>, vector<1x128xf32>
    %58 = vector.broadcast %57 : vector<1x128xf32> to vector<8x128xf32>
    %59 = arith.addf %56, %58 : vector<8x128xf32>
    %c0_22 = arith.constant 0 : index
    %c0_23 = arith.constant 0 : index
    %60 = vector.load %arg7[%c0_22, %c0_23] : memref<8x128xf32, #tpu.memory_space<vmem>>, vector<8x128xf32>
    tpu.vector_store %arg7[%c0_22, %c0_23], %59 {strides = array<i32>} : memref<8x128xf32, #tpu.memory_space<vmem>>, vector<8x128xf32>,
    return
  }
  func.func @transform_0(%arg0: i32) -> (i32, i32) {
    %c0_i32 = arith.constant 0 : i32
    %c0_i32_0 = arith.constant 0 : i32
    return %arg0, %c0_i32 : i32, i32
  }
  func.func @transform_1(%arg0: i32) -> (i32, i32) {
    %c0_i32 = arith.constant 0 : i32
    %c0_i32_0 = arith.constant 0 : i32
    %c0_i32_1 = arith.constant 0 : i32
    return %c0_i32, %c0_i32_0 : i32, i32
  }
  func.func @transform_2(%arg0: i32) -> (i32, i32) {
    %c0_i32 = arith.constant 0 : i32
    %c0_i32_0 = arith.constant 0 : i32
    %c0_i32_1 = arith.constant 0 : i32
    return %c0_i32, %c0_i32_0 : i32, i32
  }
  func.func @transform_3(%arg0: i32) -> (i32, i32) {
    %c0_i32 = arith.constant 0 : i32
    %c0_i32_0 = arith.constant 0 : i32
    %c0_i32_1 = arith.constant 0 : i32
    return %c0_i32, %c0_i32_0 : i32, i32
  }
  func.func @transform_4(%arg0: i32) -> (i32, i32) {
    %c0_i32 = arith.constant 0 : i32
    %c0_i32_0 = arith.constant 0 : i32
    %c0_i32_1 = arith.constant 0 : i32
    return %c0_i32, %c0_i32_0 : i32, i32
  }
  func.func @transform_5(%arg0: i32) -> (i32, i32) {
    %c0_i32 = arith.constant 0 : i32
    %c0_i32_0 = arith.constant 0 : i32
    %c0_i32_1 = arith.constant 0 : i32
    return %c0_i32, %c0_i32_0 : i32, i32
  }
  func.func @transform_6(%arg0: i32) -> (i32, i32) {
    %c0_i32 = arith.constant 0 : i32
    %c0_i32_0 = arith.constant 0 : i32
    return %arg0, %c0_i32 : i32, i32
  }
}

</mosaic_0001>

<bundles_post_ra>
// kernel: cnn_forward.1
= control target key start
LH: loop header
LB: loop body
LE: loop exit
PB: predicated region body
PF: predicated region fallthrough
CT: control target
= control target key end

     0   :  { %s2512_s21 = smov 0   ;;  %s3200_s0 = inlined_call_operand.vmem [shape: s32[256,1], index: 0, kind: input, shape index: {}]   ;;  %s3201_s1 = inlined_call_operand.vmem [shape: bf16[64,32], index: 1, kind: input, shape index: {}]   ;;  %s3202_s2 = inlined_call_operand.vmem [shape: bf16[160,384], index: 2, kind: input, shape index: {}]   ;;  %s3203_s3 = inlined_call_operand.vmem [shape: f32[1,384], index: 3, kind: input, shape index: {}]   ;;  %s3204_s4 = inlined_call_operand.vmem [shape: bf16[384,128], index: 4, kind: input, shape index: {}]   ;;  %s3205_s5 = inlined_call_operand.vmem [shape: f32[1,128], index: 5, kind: input, shape index: {}]   ;;  %s3206_s6 = inlined_call_operand.vmem [shape: f32[16,128], index: 6, kind: output, shape index: {}]  }
   0x1 LB: > { %s2518_s22 = sadd.s32 4294967295, %s2469_s21   ;;  %p2203_p0 = scmp.ge.s32.totalorder %s2469_s21, 1  ;;  %s2469_s21 = sphi %s2512_s21, %s16_s21  }
   0x2   : > { %p213_p1 = scmp.lt.s32.totalorder %s2469_s21, 3 }
   0x4   : > { %p214_p2 = pnand %p2203_p0, %p213_p1 }
   0x5   : > { %s2204_s23 = sshll.u32 (!%p214_p2), %s2518_s22, 4  ;;  %v2471_v0 = vmov (!%p214_p2), 0   ;;  %v2395_v1 = vld [vmem:[%s3201_s1] sm:$0xff] (!%p214_p2)   ;;  %v2396_v2 = vld [vmem:[%s3201_s1 + $0x8] sm:$0xff] (!%p214_p2)   ;;  %v2397_v9 = vld [vmem:[%s3201_s1 + $0x10] sm:$0xff] (!%p214_p2)   ;;  %v269_v21 = vlaneseq (!%p214_p2)  ;;  %vm391_vm4 = vcmask (!%p214_p2), 523264  }
   0x6   : > { %217 = sbr.rel (%p214_p2) target bundleno = 1040 (0x410), region = 44  ;;  %2394 = vset.pattern.permute.xlu1 (!%p214_p2), %v2471_v0  ;;  %2393 = vset.pattern.permute.xlu0 (!%p214_p2), %v2471_v0  ;;  %p243_p3 = scmp.lt.s32.totalorder (!%p214_p2), %s2204_s23, 31  ;;  %v2398_v10 = vld [vmem:[%s3201_s1 + $0x18] sm:$0xff] (!%p214_p2)   ;;  %v2472_v27 = vmov (!%p214_p2), 0.0  }
   0x7   : > { %2335 = vmatprep.subr.bf16.mxu0 (!%p214_p2), %v2395_v1  ;;  %v2560_v22 = vand.u32 (!%p214_p2), 127, %v269_v21  ;;  %s2473_s30 = smov (!%p214_p2), 64   ;;  %s2475_s8 = smov (!%p214_p2), 96  }
   0x8   : > { %2336 = vmatpush3.bf16.msra.mxu0 (!%p214_p2), %v2395_v1  ;;  %v2399_v1 = vld [vmem:[%s3202_s2 + $0x4] ss:$12 sps:$4 sm:$0xff] (!%p214_p2)   ;;  %p248_p4 = scmp.lt.s32.totalorder (!%p214_p2), %s2518_s22, 1 }
   0x9   : > { %2337 = vmatprep.subr.bf16.mxu0 (!%p214_p2), %v2396_v2  ;;  %1020 = vmatprep.subr.bf16.mxu1 (!%p214_p2), %v2399_v1 }
   0xc   : > { %2338 = vmatpush3.bf16.msra.mxu0 (!%p214_p2), %v2396_v2  ;;  %v2401_v2 = vld [vmem:[%s3202_s2] ss:$12 sps:$4 sm:$0xff] (!%p214_p2)  }
   0xd   : > { %s3208_s23 = smov (!%p243_p3, %s2204_s23), 31  ;;  %2339 = vmatprep.subr.bf16.mxu0 %v2397_v9  ;;  %1021 = vmatpush1.bf16.msra.mxu1 %v2401_v2  ;;  %s3210_s22 = smov (!%p248_p4, %s2518_s22), 1 }
   0xe   : > { %s2205_s28 = sshll.u32 %s3208_s23, 3  ;;  %s2206_s17 = sshll.u32 %s3210_s22, 3 }
   0xf   : > { %s2534_s7 = scalar_lea.vmem %s3200_s0, %s2205_s28  ;;  %s251_s20 = scalar_lea.vmem %s3206_s6, %s2206_s17 }
  0x10   : > { %v255_v3 = vld [vmem:[%s2534_s7 + $0x10] sm:$0xff]  ;;  %v253_v4 = vld [vmem:[%s2534_s7] sm:$0xff]  ;;  %v256_v5 = vld [vmem:[%s2534_s7 + $0x18] sm:$0xff]  ;;  %2340 = vmatpush3.bf16.msra.mxu0 %v2397_v9 }
  0x11   : > { %278 = vperm.xlu1 %2394, %v255_v3   ;;  %272 = vperm.xlu0 %2393, %v253_v4   ;;  %v254_v6 = vld [vmem:[%s2534_s7 + $0x8] sm:$0xff]  ;;  %v257_v8 = vld [vmem:[%s2534_s7 + $0x20] sm:$0xff]  ;;  %v260_v11 = vld [vmem:[%s2534_s7 + $0x38] sm:$0xff] }
  0x12   : > { %v258_v7 = vld [vmem:[%s2534_s7 + $0x28] sm:$0xff]  ;;  %v259_v12 = vld [vmem:[%s2534_s7 + $0x30] sm:$0xff]  ;;  %2341 = vmatprep.subr.bf16.mxu0 %v2398_v10  ;;  %v261_v14 = vld [vmem:[%s2534_s7 + $0x40] sm:$0xff] }
  0x13   : > { %v262_v13 = vld [vmem:[%s2534_s7 + $0x48] sm:$0xff]  ;;  %v264_v15 = vld [vmem:[%s2534_s7 + $0x58] sm:$0xff]  ;;  %v263_v16 = vld [vmem:[%s2534_s7 + $0x50] sm:$0xff] }
  0x14   : > { %2342 = vmatpush3.bf16.msra.mxu0 %v2398_v10  ;;  %v266_v17 = vld [vmem:[%s2534_s7 + $0x68] sm:$0xff]  ;;  %v265_v18 = vld [vmem:[%s2534_s7 + $0x60] sm:$0xff]  ;;  %v268_v19 = vld [vmem:[%s2534_s7 + $0x78] sm:$0xff] }
  0x15   : > { %281 = vperm.xlu1 %2394, %v256_v5   ;;  %275 = vperm.xlu0 %2393, %v254_v6   ;;  %v267_v20 = vld [vmem:[%s2534_s7 + $0x70] sm:$0xff]  ;;  %v2403_v4 = vld [vmem:[%s3202_s2 + $0x1c] ss:$12 sps:$4 sm:$0xff]   ;;  %v2406_v5 = vld [vmem:[%s3202_s2 + $0x20] ss:$12 sps:$4 sm:$0xff]   ;;  %s2474_s7 = smov 32  }
  0x16   : > { %1133 = vmatprep.subr.bf16.mxu0 %v2471_v0  ;;  %v2402_v3 = vld [vmem:[%s3202_s2 + $0x8] ss:$12 sps:$4 sm:$0xff]   ;;  %v2405_v6 = vld [vmem:[%s3202_s2 + $0x18] ss:$12 sps:$4 sm:$0xff]   ;;  %1022 = vmatprep.subr.bf16.mxu1 %v2403_v4  ;;  %v2409_v9 = vld [vmem:[%s3202_s2 + $0x30] ss:$12 sps:$4 sm:$0xff]  }
  0x17   : > { %1023 = vmatpush1.bf16.msra.mxu1 %v2405_v6  ;;  %v2411_v10 = vld [vmem:[%s3202_s2 + $0x4c] ss:$12 sps:$4 sm:$0xff]  }
  0x19   : > { %287 = vperm.xlu1 %2394, %v258_v7   ;;  %284 = vperm.xlu0 %2393, %v257_v8   ;;  %v2407_v7 = vld [vmem:[%s3202_s2 + $0x34] ss:$12 sps:$4 sm:$0xff]   ;;  %v2410_v8 = vld [vmem:[%s3202_s2 + $0x38] ss:$12 sps:$4 sm:$0xff]  }
  0x1a   : > { %1024 = vmatprep.subr.bf16.mxu1 %v2407_v7 }
  0x1b   : > { %1025 = vmatpush1.bf16.msra.mxu1 %v2409_v9 }
  0x1c   : > { %1026 = vmatprep.subr.bf16.mxu1 %v2411_v10 }
  0x1d   : > { %293 = vperm.xlu1 %2394, %v260_v11   ;;  %290 = vperm.xlu0 %2393, %v259_v12   ;;  %v2414_v11 = vld [vmem:[%s3202_s2 + $0x50] ss:$12 sps:$4 sm:$0xff]   ;;  %v2413_v12 = vld [vmem:[%s3202_s2 + $0x48] ss:$12 sps:$4 sm:$0xff]  }
  0x1f   : > { %1027 = vmatpush1.bf16.msra.mxu1 %v2413_v12 }
  0x21   : > { %299 = vperm.xlu1 %2394, %v262_v13   ;;  %296 = vperm.xlu0 %2393, %v261_v14   ;;  %v2415_v13 = vld [vmem:[%s3202_s2 + $0x64] ss:$12 sps:$4 sm:$0xff]   ;;  %v2418_v14 = vld [vmem:[%s3202_s2 + $0x68] ss:$12 sps:$4 sm:$0xff]  }
  0x22   : > { %1028 = vmatprep.subr.bf16.mxu1 %v2415_v13 }
  0x25   : > { %305 = vperm.xlu1 %2394, %v264_v15   ;;  %302 = vperm.xlu0 %2393, %v263_v16   ;;  %v2417_v15 = vld [vmem:[%s3202_s2 + $0x60] ss:$12 sps:$4 sm:$0xff]   ;;  %v2419_v16 = vld [vmem:[%s3202_s2 + $0x7c] ss:$12 sps:$4 sm:$0xff]  }
  0x26   : > { %1029 = vmatpush1.bf16.msra.mxu1 %v2417_v15 }
  0x27   : > { %1030 = vmatprep.subr.bf16.mxu1 %v2419_v16 }
  0x29   : > { %311 = vperm.xlu1 %2394, %v266_v17   ;;  %308 = vperm.xlu0 %2393, %v265_v18   ;;  %v2422_v17 = vld [vmem:[%s3202_s2 + $0x80] ss:$12 sps:$4 sm:$0xff]   ;;  %v2421_v18 = vld [vmem:[%s3202_s2 + $0x78] ss:$12 sps:$4 sm:$0xff]  }
  0x2a   : > { %1031 = vmatpush1.bf16.msra.mxu1 %v2421_v18 }
  0x2d   : > { %317 = vperm.xlu1 %2394, %v268_v19   ;;  %314 = vperm.xlu0 %2393, %v267_v20   ;;  %v2423_v19 = vld [vmem:[%s3202_s2 + $0x94] ss:$12 sps:$4 sm:$0xff]   ;;  %v2426_v20 = vld [vmem:[%s3202_s2 + $0x98] ss:$12 sps:$4 sm:$0xff]  }
  0x2e   : > { %1032 = vmatprep.subr.bf16.mxu1 %v2423_v19 }
  0x90   : > { %v279_v23 = vpop.permute.xlu1 %278  ;;  %v273_v24 = vpop.permute.xlu0 %272 }
  0x91   : > { %vm321_vm0 = vcmp.eq.s32.totalorder %v279_v23, %v2560_v22  ;;  %vm319_vm1 = vcmp.eq.s32.totalorder %v273_v24, %v2560_v22  ;;  %v2427_v23 = vld [vmem:[%s3202_s2 + $0xac] ss:$12 sps:$4 sm:$0xff]   ;;  %v2430_v24 = vld [vmem:[%s3202_s2 + $0xb0] ss:$12 sps:$4 sm:$0xff]  }
  0x92   : > { %v337_v28 = vsel %vm321_vm0, 1.0, %v2472_v27  ;;  %v335_v29 = vsel %vm319_vm1, 1.0, %v2472_v27  ;;  %vm703_vm1 = vcmask 1045504  }
  0x94   : > { %v282_v25 = vpop.permute.xlu1 %281  ;;  %v276_v26 = vpop.permute.xlu0 %275 }
  0x95   : > { %vm322_vm2 = vcmp.eq.s32.totalorder %v282_v25, %v2560_v22  ;;  %vm320_vm3 = vcmp.eq.s32.totalorder %v276_v26, %v2560_v22  ;;  %v2429_v25 = vld [vmem:[%s3202_s2 + $0xa8] ss:$12 sps:$4 sm:$0xff]   ;;  %v2431_v26 = vld [vmem:[%s3202_s2 + $0xc4] ss:$12 sps:$4 sm:$0xff]  }
  0x96   : > { %v338_v30 = vsel %vm322_vm2, 1.0, %v2472_v27  ;;  %v336_v31 = vsel %vm320_vm3, 1.0, %v2472_v27  ;;  %vm721_vm2 = vcmask 261120   ;;  %vm615_vm3 = vcmask 1046528  }
  0x97   : > { %v352_v32 = vpack.c.bf16 %v338_v30, %v337_v28  ;;  %v351_v33 = vpack.c.bf16 %v336_v31, %v335_v29  ;;  %v2433_v28 = vld [vmem:[%s3202_s2 + $0xc0] ss:$12 sps:$4 sm:$0xff]   ;;  %v2434_v29 = vld [vmem:[%s3202_s2 + $0xc8] ss:$12 sps:$4 sm:$0xff]  }
  0x98   : > { %v288_v34 = vpop.permute.xlu1 %287  ;;  %v285_v35 = vpop.permute.xlu0 %284  ;;  %v2435_v31 = vld [vmem:[%s3202_s2 + $0xdc] ss:$12 sps:$4 sm:$0xff]  }
  0x99   : > { %vm324_vm5 = vcmp.eq.s32.totalorder %v288_v34, %v2560_v22  ;;  %vm323_vm6 = vcmp.eq.s32.totalorder %v285_v35, %v2560_v22  ;;  %2343 = vmatprep.mubr.msk.bf16.mxu0 %vm391_vm4, %v351_v33  ;;  %v2438_v34 = vld [vmem:[%s3202_s2 + $0xe0] ss:$12 sps:$4 sm:$0xff]  }
  0x9a   : > { %v340_v36 = vsel %vm324_vm5, 1.0, %v2472_v27  ;;  %v339_v37 = vsel %vm323_vm6, 1.0, %v2472_v27  ;;  %2344 = vmatmul.mubr.msk.bf16.vlgmr.msra.gmra.mrb[0].mxu0 %vm391_vm4, %v352_v32  ;;  %v2437_v32 = vld [vmem:[%s3202_s2 + $0xd8] ss:$12 sps:$4 sm:$0xff]   ;;  %vm521_vm5 = vsmask.f32 7424 }
  0x9b   : > { %v353_v38 = vpack.c.bf16 %v340_v36, %v339_v37  ;;  %1134 = vmatpush1.bf16.msra.mxu0 %v2402_v3  ;;  %vm649_vm6 = vsmask.f32 6400 }
  0x9c   : > { %v294_v39 = vpop.permute.xlu1 %293  ;;  %v291_v40 = vpop.permute.xlu0 %290  ;;  %1135 = vmatprep.subr.bf16.mxu0 %v2471_v0 }
  0x9d   : > { %vm326_vm7 = vcmp.eq.s32.totalorder %v294_v39, %v2560_v22  ;;  %vm325_vm8 = vcmp.eq.s32.totalorder %v291_v40, %v2560_v22  ;;  %2347 = vmatprep.mubr.msk.bf16.mxu0 %vm391_vm4, %v353_v38 }
  0x9e   : > { %v342_v41 = vsel %vm326_vm7, 1.0, %v2472_v27  ;;  %v341_v42 = vsel %vm325_vm8, 1.0, %v2472_v27  ;;  %vm754_vm7 = vcmask 785408  }
  0x9f   : > { %v354_v43 = vpack.c.bf16 %v342_v41, %v341_v42  ;;  %1136 = vmatpush1.bf16.msra.mxu0 %v2406_v5 }
  0xa0   : > { %v300_v44 = vpop.permute.xlu1 %299  ;;  %v297_v45 = vpop.permute.xlu0 %296  ;;  %1137 = vmatprep.subr.bf16.mxu0 %v2471_v0 }
  0xa1   : > { %vm328_vm9 = vcmp.eq.s32.totalorder %v300_v44, %v2560_v22  ;;  %vm327_vm10 = vcmp.eq.s32.totalorder %v297_v45, %v2560_v22 }
  0xa2   : > { %v344_v46 = vsel %vm328_vm9, 1.0, %v2472_v27  ;;  %v343_v47 = vsel %vm327_vm10, 1.0, %v2472_v27  ;;  %2348 = vmatmul.mubr.msk.bf16.gmra.mrb[4].mxu0 %vm391_vm4, %v354_v43 }
  0xa3   : > { %v355_v48 = vpack.c.bf16 %v344_v46, %v343_v47  ;;  %1138 = vmatpush1.bf16.msra.mxu0 %v2410_v8 }
  0xa4   : > { %v306_v49 = vpop.permute.xlu1 %305  ;;  %v303_v50 = vpop.permute.xlu0 %302  ;;  %1139 = vmatprep.subr.bf16.mxu0 %v2471_v0 }
  0xa5   : > { %vm330_vm11 = vcmp.eq.s32.totalorder %v306_v49, %v2560_v22  ;;  %vm329_vm12 = vcmp.eq.s32.totalorder %v303_v50, %v2560_v22  ;;  %2351 = vmatprep.mubr.msk.bf16.mxu0 %vm391_vm4, %v355_v48 }
  0xa6   : > { %v346_v51 = vsel %vm330_vm11, 1.0, %v2472_v27  ;;  %v345_v52 = vsel %vm329_vm12, 1.0, %v2472_v27 }
  0xa7   : > { %v356_v53 = vpack.c.bf16 %v346_v51, %v345_v52  ;;  %1140 = vmatpush1.bf16.msra.mxu0 %v2414_v11 }
  0xa8   : > { %v312_v54 = vpop.permute.xlu1 %311  ;;  %v309_v55 = vpop.permute.xlu0 %308  ;;  %1141 = vmatprep.subr.bf16.mxu0 %v2471_v0 }
  0xa9   : > { %vm332_vm13 = vcmp.eq.s32.totalorder %v312_v54, %v2560_v22  ;;  %vm331_vm14 = vcmp.eq.s32.totalorder %v309_v55, %v2560_v22 }
  0xaa   : > { %v348_v56 = vsel %vm332_vm13, 1.0, %v2472_v27  ;;  %v347_v57 = vsel %vm331_vm14, 1.0, %v2472_v27  ;;  %2352 = vmatmul.mubr.msk.bf16.gmra.mrb[8].mxu0 %vm391_vm4, %v356_v53 }
  0xab   : > { %v357_v58 = vpack.c.bf16 %v348_v56, %v347_v57  ;;  %1142 = vmatpush1.bf16.msra.mxu0 %v2418_v14 }
  0xac   : > { %v318_v59 = vpop.permute.xlu1 %317  ;;  %v315_v60 = vpop.permute.xlu0 %314  ;;  %1143 = vmatprep.subr.bf16.mxu0 %v2471_v0 }
  0xad   : > { %vm334_vm15 = vcmp.eq.s32.totalorder %v318_v59, %v2560_v22  ;;  %vm333_vm0 = vcmp.eq.s32.totalorder %v315_v60, %v2560_v22  ;;  %2355 = vmatprep.mubr.msk.bf16.mxu0 %vm391_vm4, %v357_v58  ;;  %v2425_v22 = vld [vmem:[%s3202_s2 + $0x90] ss:$12 sps:$4 sm:$0xff]  }
  0xae   : > { %v350_v61 = vsel %vm334_vm15, 1.0, %v2472_v27  ;;  %v349_v62 = vsel %vm333_vm0, 1.0, %v2472_v27  ;;  %1033 = vmatpush1.bf16.msra.mxu1 %v2425_v22 }
  0xaf   : > { %v358_v63 = vpack.c.bf16 %v350_v61, %v349_v62  ;;  %1144 = vmatpush1.bf16.msra.mxu0 %v2422_v17  ;;  %1034 = vmatprep.subr.bf16.mxu1 %v2427_v23 }
  0xb0   : > { %1145 = vmatprep.subr.bf16.mxu0 %v2471_v0 }
  0xb2   : > { %2356 = vmatmul.mubr.msk.bf16.gmra.mrb[12].mxu0 %vm391_vm4, %v358_v63  ;;  %1035 = vmatpush1.bf16.msra.mxu1 %v2429_v25 }
  0xb3   : > { %1146 = vmatpush1.bf16.msra.mxu0 %v2426_v20  ;;  %1036 = vmatprep.subr.bf16.mxu1 %v2431_v26 }
  0xb4   : > { %1147 = vmatprep.subr.bf16.mxu0 %v2471_v0 }
  0xb6   : > { %1037 = vmatpush1.bf16.msra.mxu1 %v2433_v28 }
  0xb7   : > { %1148 = vmatpush1.bf16.msra.mxu0 %v2430_v24  ;;  %1038 = vmatprep.subr.bf16.mxu1 %v2435_v31 }
  0xb8   : > { %1149 = vmatprep.subr.bf16.mxu0 %v2471_v0 }
  0xba   : > { %1039 = vmatpush1.bf16.msra.mxu1 %v2437_v32 }
  0xbb   : > { %1150 = vmatpush1.bf16.msra.mxu0 %v2434_v29 }
  0xbc   : > { %1151 = vmatprep.subr.bf16.mxu0 %v2471_v0 }
  0xbf   : > { %1152 = vmatpush1.bf16.msra.mxu0 %v2438_v34 }
  0xc0   : > { %2359 = vmatprep.subr.bf16.mxu0 %v2472_v27 }
 0x16d   : > { %v2345_v30 = vpop.f32.mrb[0].mxu0 }
 0x16e   : > { %v450_v33 = vpop.f32.mrb[1].mxu0 }
 0x16f   : > { %v2346_v35 = vpop.f32.mrb[2].mxu0 }
 0x170   : > { %v2701_v36 = vpack.c.bf16 %v2346_v35, %v2345_v30  ;;  %v453_v37 = vpop.f32.mrb[3].mxu0 }
 0x171   : > { %v2703_v38 = vpack.c.bf16 %v453_v37, %v450_v33 }
 0x172   : > { %v705_v39 = vrot.slane %v2701_v36, 2  ;;  %v617_v40 = vrot.slane %v2701_v36, 1  ;;  %v530_v41 = vshll.u32 %v2701_v36, 16  ;;  %v534_v42 = vshrl.u32 %v2701_v36, 16 }
 0x173   : > { %v704_v43 = vrot.slane %v2703_v38, 2  ;;  %v616_v44 = vrot.slane %v2703_v38, 1  ;;  %v523_v45 = vshrl.u32 %v2703_v38, 16  ;;  %v525_v46 = vshll.u32 %v2703_v38, 16 }
 0x174   : > { %v653_v47 = vrot.slane %v534_v42, 1  ;;  %v654_v48 = vrot.slane %v530_v41, 2  ;;  %v532_v58 = vrot.slane %v530_v41, 1 }
 0x175   : > { %v2349_v49 = vpop.f32.mrb[4].mxu0  ;;  %v706_v50 = vsel %vm703_vm1, %v704_v43, %v705_v39  ;;  %v618_v51 = vsel %vm615_vm3, %v616_v44, %v617_v40  ;;  %v527_v52 = vrot.slane %v525_v46, 1  ;;  %v650_v53 = vrot.slane %v523_v45, 1 }
 0x176   : > { %2249 = vmatprep.mubr.msk.bf16.mxu1 %vm721_vm2, %v706_v50  ;;  %633 = vrot.lane.b32.xlu1 %v618_v51, %s2473_s30  ;;  %v466_v54 = vpop.f32.mrb[5].mxu0  ;;  %v651_v55 = vrot.slane %v525_v46, 2  ;;  %v655_v62 = vor.u32 %v654_v48, %v653_v47  ;;  %v536_v6 = vor.u32 %v534_v42, %v532_v58 }
 0x177   : > { %2257 = vmatprep.mubr.msk.bf16.mxu0 %vm721_vm2, %v706_v50  ;;  %v2350_v56 = vpop.f32.mrb[6].mxu0  ;;  %v528_v57 = vor.u32 %v527_v52, %v523_v45 }
 0x178   : > { %v2719_v59 = vpack.c.bf16 %v2350_v56, %v2349_v49  ;;  %v469_v60 = vpop.f32.mrb[7].mxu0  ;;  %v652_v61 = vor.u32 %v651_v55, %v650_v53 }
 0x179   : > { %v2721_v63 = vpack.c.bf16 %v469_v60, %v466_v54  ;;  %v533_v1 = vsel %vm521_vm5, %v528_v57, %v532_v58 }
 0x17a   : > { %590 = vrot.lane.b32.xlu0 %v533_v1, %s2474_s7  ;;  %v656_v5 = vsel %vm649_vm6, %v652_v61, %v655_v62  ;;  %v546_v7 = vshll.u32 %v2719_v59, 16  ;;  %v550_v8 = vshrl.u32 %v2719_v59, 16  ;;  %v621_v28 = vrot.slane %v2719_v59, 1 }
 0x17b   : > { %v538_v2 = vshll.u32 %v2721_v63, 16  ;;  %v542_v3 = vshrl.u32 %v2721_v63, 16  ;;  %v707_v4 = vrot.slane %v2721_v63, 2  ;;  %v619_v11 = vrot.slane %v2721_v63, 1 }
 0x17c   : > { %v661_v22 = vrot.slane %v550_v8, 1  ;;  %v662_v23 = vrot.slane %v546_v7, 2  ;;  %v548_v30 = vrot.slane %v546_v7, 1 }
 0x17d   : > { %v2353_v9 = vpop.f32.mrb[8].mxu0  ;;  %v540_v10 = vrot.slane %v538_v2, 1  ;;  %v657_v12 = vrot.slane %v542_v3, 1  ;;  %v658_v13 = vrot.slane %v538_v2, 2  ;;  %v2736_v15 = vsel %vm703_vm1, %v705_v39, %v707_v4 }
 0x17e   : > { %687 = vrot.lane.b32.xlu0 %v656_v5, %s2475_s8  ;;  %v482_v14 = vpop.f32.mrb[9].mxu0  ;;  %v620_v25 = vsel %vm615_vm3, %v617_v40, %v619_v11  ;;  %v663_v33 = vor.u32 %v662_v23, %v661_v22  ;;  %v622_v40 = vsel %vm615_vm3, %v619_v11, %v621_v28  ;;  %v552_v47 = vor.u32 %v550_v8, %v548_v30 }
 0x17f   : > { %v2354_v16 = vpop.f32.mrb[10].mxu0  ;;  %v541_v17 = vsel %vm521_vm5, %v536_v6, %v540_v10  ;;  %v659_v18 = vor.u32 %v658_v13, %v657_v12  ;;  %v544_v26 = vor.u32 %v542_v3, %v540_v10 }
 0x180   : > { %v2739_v19 = vpack.c.bf16 %v2354_v16, %v2353_v9  ;;  %592 = vrot.lane.b32.xlu1 %v541_v17, %s2474_s7  ;;  %v485_v20 = vpop.f32.mrb[11].mxu0 }
 0x181   : > { %v2742_v24 = vpack.c.bf16 %v485_v20, %v482_v14  ;;  %v660_v29 = vsel %vm649_vm6, %v655_v62, %v659_v18  ;;  %v549_v35 = vsel %vm521_vm5, %v544_v26, %v548_v30  ;;  %v664_v46 = vsel %vm649_vm6, %v659_v18, %v663_v33 }
 0x182   : > { %635 = vrot.lane.b32.xlu0 %v620_v25, %s2473_s30  ;;  %v562_v50 = vshll.u32 %v2739_v19, 16  ;;  %v566_v51 = vshrl.u32 %v2739_v19, 16  ;;  %v625_v58 = vrot.slane %v2739_v19, 1 }
 0x183   : > { %v554_v31 = vshll.u32 %v2742_v24, 16  ;;  %v558_v32 = vshrl.u32 %v2742_v24, 16  ;;  %v623_v49 = vrot.slane %v2742_v24, 1 }
 0x184   : > { %689 = vrot.lane.b32.xlu1 %v660_v29, %s2475_s8  ;;  %v669_v56 = vrot.slane %v566_v51, 1  ;;  %v670_v57 = vrot.slane %v562_v50, 2  ;;  %v564_v61 = vrot.slane %v562_v50, 1 }
 0x185   : > { %v2357_v34 = vpop.f32.mrb[12].mxu0  ;;  %v556_v41 = vrot.slane %v554_v31, 1  ;;  %v665_v42 = vrot.slane %v558_v32, 1  ;;  %v666_v43 = vrot.slane %v554_v31, 2  ;;  %v624_v54 = vsel %vm615_vm3, %v621_v28, %v623_v49 }
 0x186   : > { %594 = vrot.lane.b32.xlu0 %v549_v35, %s2474_s7  ;;  %v498_v37 = vpop.f32.mrb[13].mxu0  ;;  %v671_v3 = vor.u32 %v670_v57, %v669_v56  ;;  %v626_v5 = vsel %vm615_vm3, %v623_v49, %v625_v58  ;;  %v568_v9 = vor.u32 %v566_v51, %v564_v61 }
 0x187   : > { %v2358_v39 = vpop.f32.mrb[14].mxu0  ;;  %v557_v52 = vsel %vm521_vm5, %v552_v47, %v556_v41  ;;  %v667_v53 = vor.u32 %v666_v43, %v665_v42  ;;  %v560_v55 = vor.u32 %v558_v32, %v556_v41 }
 0x188   : > { %v2754_v44 = vpack.c.bf16 %v2358_v39, %v2357_v34  ;;  %637 = vrot.lane.b32.xlu1 %v622_v40, %s2473_s30  ;;  %v501_v45 = vpop.f32.mrb[15].mxu0  ;;  %v2796_v34 = vrot.slane %v2471_v0, 2 }
 0x189   : > { %v2758_v48 = vpack.c.bf16 %v501_v45, %v498_v37  ;;  %v668_v60 = vsel %vm649_vm6, %v663_v33, %v667_v53  ;;  %v565_v2 = vsel %vm521_vm5, %v560_v55, %v564_v61  ;;  %v672_v10 = vsel %vm649_vm6, %v667_v53, %v671_v3 }
 0x18a   : > { %691 = vrot.lane.b32.xlu0 %v664_v46, %s2475_s8  ;;  %v578_v12 = vshll.u32 %v2754_v44, 16  ;;  %v582_v13 = vshrl.u32 %v2754_v44, 16  ;;  %v629_v26 = vrot.slane %v2754_v44, 1  ;;  %v588_v33 = vrot.slane %v2471_v0, 1 }
 0x18b   : > { %v570_v62 = vshll.u32 %v2758_v48, 16  ;;  %v574_v1 = vshrl.u32 %v2758_v48, 16  ;;  %v627_v11 = vrot.slane %v2758_v48, 1 }
 0x18c   : > { %596 = vrot.lane.b32.xlu1 %v557_v52, %s2474_s7  ;;  %v677_v20 = vrot.slane %v582_v13, 1  ;;  %v678_v22 = vrot.slane %v578_v12, 2  ;;  %v580_v25 = vrot.slane %v578_v12, 1  ;;  %v685_v37 = vor.u32 %v2796_v34, %v588_v33 }
 0x18d   : > { %v572_v6 = vrot.slane %v570_v62, 1  ;;  %v673_v7 = vrot.slane %v574_v1, 1  ;;  %v674_v8 = vrot.slane %v570_v62, 2  ;;  %v628_v17 = vsel %vm615_vm3, %v625_v58, %v627_v11 }
 0x18e   : > { %639 = vrot.lane.b32.xlu0 %v624_v54, %s2473_s30  ;;  %v679_v29 = vor.u32 %v678_v22, %v677_v20  ;;  %v630_v30 = vsel %vm615_vm3, %v627_v11, %v629_v26  ;;  %v584_v31 = vor.u32 %v582_v13, %v580_v25  ;;  %v632_v39 = vsel %vm615_vm3, %v629_v26, %v588_v33 }
 0x18f   : > { %v573_v14 = vsel %vm521_vm5, %v568_v9, %v572_v6  ;;  %v675_v16 = vor.u32 %v674_v8, %v673_v7  ;;  %v576_v18 = vor.u32 %v574_v1, %v572_v6  ;;  %v709_v52 = vrot.slane %v2719_v59, 2 }
 0x190   : > { %693 = vrot.lane.b32.xlu1 %v668_v60, %s2475_s8  ;;  %v589_v35 = vsel %vm521_vm5, %v584_v31, %v588_v33  ;;  %v686_v40 = vsel %vm649_vm6, %v679_v29, %v685_v37  ;;  %v711_v60 = vrot.slane %v2742_v24, 2  ;;  %v715_v12 = vrot.slane %v2758_v48, 2 }
 0x191   : > { %v676_v23 = vsel %vm649_vm6, %v671_v3, %v675_v16  ;;  %v581_v28 = vsel %vm521_vm5, %v576_v18, %v580_v25  ;;  %v680_v32 = vsel %vm649_vm6, %v675_v16, %v679_v29  ;;  %v717_v20 = vrot.slane %v2754_v44, 2 }
 0x192   : > { %598 = vrot.lane.b32.xlu0 %v565_v2, %s2474_s7  ;;  %vm1889_vm6 = vcmask 1042434  }
 0x193   : > { %v718_v26 = vsel %vm703_vm1, %v715_v12, %v717_v20 }
 0x194   : > { %641 = vrot.lane.b32.xlu1 %v626_v5, %s2473_s30  ;;  %v713_v5 = vrot.slane %v2739_v19, 2 }
 0x196   : > { %695 = vrot.lane.b32.xlu0 %v672_v10, %s2475_s8  ;;  %v714_v8 = vsel %vm703_vm1, %v711_v60, %v713_v5  ;;  %v716_v16 = vsel %vm703_vm1, %v713_v5, %v715_v12 }
 0x198   : > { %600 = vrot.lane.b32.xlu1 %v573_v14, %s2474_s7 }
 0x19a   : > { %643 = vrot.lane.b32.xlu0 %v628_v17, %s2473_s30 }
 0x19c   : > { %697 = vrot.lane.b32.xlu1 %v676_v23, %s2475_s8 }
 0x19e   : > { %602 = vrot.lane.b32.xlu0 %v581_v28, %s2474_s7 }
 0x1a0   : > { %645 = vrot.lane.b32.xlu1 %v630_v30, %s2473_s30 }
 0x1a2   : > { %699 = vrot.lane.b32.xlu0 %v680_v32, %s2475_s8  ;;  %v720_v32 = vsel %vm703_vm1, %v717_v20, %v2796_v34  ;;  %v2441_v34 = vld [vmem:[%s3204_s4 + $0x80] sm:$0xff]  }
 0x1a4   : > { %604 = vrot.lane.b32.xlu1 %v589_v35, %s2474_s7 }
 0x1a6   : > { %647 = vrot.lane.b32.xlu0 %v632_v39, %s2473_s30 }
 0x1a8   : > { %701 = vrot.lane.b32.xlu1 %v686_v40, %s2475_s8  ;;  %v2439_v40 = vld [vmem:[%s3204_s4 + $0x40] sm:$0xff]  }
 0x1a9   : > { %2304 = vmatprep.subr.bf16.mxu1 %v2439_v40 }
 0x1e8   : > { %v634_v42 = vpop.permute.xlu1 %633 }
 0x1ec   : > { %v591_v41 = vpop.permute.xlu0 %590 }
 0x1ed   : > { %v723_v0 = vsel %vm721_vm2, %v2703_v38, %v591_v41  ;;  %v2442_v41 = vld [vmem:[%s3204_s4 + $0x48] sm:$0xff]  }
 0x1ee   : > { %v739_v45 = vsel %vm391_vm4, %v723_v0, %v634_v42  ;;  %v2443_v0 = vld [vmem:[%s3204_s4 + $0x8] sm:$0xff]  }
 0x1ef   : > { %v2444_v42 = vld [vmem:[%s3204_s4 + $0x88] sm:$0xff]  }
 0x1f0   : > { %v688_v43 = vpop.permute.xlu0 %687 }
 0x1f1   : > { %v756_v46 = vsel %vm754_vm7, %v739_v45, %v688_v43  ;;  %v2445_v43 = vld [vmem:[%s3204_s4 + $0x50] sm:$0xff]  }
 0x1f2   : > { %v593_v47 = vpop.permute.xlu1 %592  ;;  %1053 = vmatmul.mubr.bf16.vlgmr.msra.gmra.mrb[0].mxu1 %v756_v46  ;;  %1166 = vmatmul.mubr.bf16.vlgmr.msra.gmra.mrb[16].mxu0 %v756_v46  ;;  %v2446_v45 = vld [vmem:[%s3204_s4 + $0x10] sm:$0xff]  }
 0x1f3   : > { %v725_v49 = vsel %vm721_vm2, %v2701_v36, %v593_v47  ;;  %2250 = vmatprep.mubr.msk.bf16.mxu1 %vm721_vm2, %v2736_v15  ;;  %2258 = vmatprep.mubr.msk.bf16.mxu0 %vm721_vm2, %v2736_v15  ;;  %v710_v36 = vsel %vm703_vm1, %v707_v4, %v709_v52  ;;  %v712_v4 = vsel %vm703_vm1, %v709_v52, %v711_v60  ;;  %v2447_v46 = vld [vmem:[%s3204_s4 + $0x90] sm:$0xff]   ;;  %v2448_v47 = vld [vmem:[%s3204_s4 + $0x58] sm:$0xff]   ;;  %v2453_v52 = vld [vmem:[%s3204_s4 + $0xa0] sm:$0xff]   ;;  %vm1887_vm1 = vcmask 1041409  }
 0x1f4   : > { %v636_v38 = vpop.permute.xlu0 %635  ;;  %2360 = vmatpush3.bf16.msra.mxu0 %v2441_v34  ;;  %v2461_v60 = vld [vmem:[%s3204_s4 + $0x38] sm:$0xff]  }
 0x1f5   : > { %v741_v50 = vsel %vm391_vm4, %v725_v49, %v636_v38  ;;  %2361 = vmatprep.subr.bf16.mxu0 %v2472_v27  ;;  %v2449_v49 = vld [vmem:[%s3204_s4 + $0x18] sm:$0xff]  }
 0x1f6   : > { %v690_v51 = vpop.permute.xlu1 %689  ;;  %v2450_v38 = vld [vmem:[%s3204_s4 + $0x98] sm:$0xff]  }
 0x1f7   : > { %v759_v54 = vsel %vm754_vm7, %v741_v50, %v690_v51  ;;  %v2451_v50 = vld [vmem:[%s3204_s4 + $0x60] sm:$0xff]  }
 0x1f8   : > { %v595_v53 = vpop.permute.xlu0 %594  ;;  %2362 = vmatpush3.bf16.msra.mxu0 %v2444_v42  ;;  %v2452_v51 = vld [vmem:[%s3204_s4 + $0x20] sm:$0xff]  }
 0x1f9   : > { %v727_v56 = vsel %vm721_vm2, %v2721_v63, %v595_v53  ;;  %2363 = vmatprep.subr.bf16.mxu0 %v2472_v27  ;;  %v2456_v53 = vld [vmem:[%s3204_s4 + $0xa8] sm:$0xff]  }
 0x1fa   : > { %v638_v55 = vpop.permute.xlu1 %637  ;;  %1063 = vmatmul.mubr.bf16.gmra.mrb[4].mxu1 %v759_v54  ;;  %1174 = vmatmul.mubr.bf16.gmra.mrb[20].mxu0 %v759_v54  ;;  %v2454_v54 = vld [vmem:[%s3204_s4 + $0x68] sm:$0xff]  }
 0x1fb   : > { %2251 = vmatprep.mubr.msk.bf16.mxu1 %vm721_vm2, %v710_v36  ;;  %2259 = vmatprep.mubr.msk.bf16.mxu0 %vm721_vm2, %v710_v36  ;;  %v743_v57 = vsel %vm391_vm4, %v727_v56, %v638_v55  ;;  %v2455_v55 = vld [vmem:[%s3204_s4 + $0x28] sm:$0xff]   ;;  %v2459_v36 = vld [vmem:[%s3204_s4 + $0xb0] sm:$0xff]  }
 0x1fc   : > { %v692_v15 = vpop.permute.xlu0 %691  ;;  %2364 = vmatpush3.bf16.msra.mxu0 %v2447_v46  ;;  %v2457_v56 = vld [vmem:[%s3204_s4 + $0x70] sm:$0xff]  }
 0x1fd   : > { %v762_v62 = vsel %vm754_vm7, %v743_v57, %v692_v15  ;;  %2365 = vmatprep.subr.bf16.mxu0 %v2472_v27  ;;  %v2458_v15 = vld [vmem:[%s3204_s4 + $0x30] sm:$0xff]   ;;  %v2460_v57 = vld [vmem:[%s3204_s4 + $0x78] sm:$0xff]  }
 0x1fe   : > { %v597_v58 = vpop.permute.xlu1 %596 }
 0x1ff   : > { %v729_v63 = vsel %vm721_vm2, %v2719_v59, %v597_v58  ;;  %v2462_v58 = vld [vmem:[%s3204_s4 + $0xb8] sm:$0xff]  }
 0x200   : > { %v640_v61 = vpop.permute.xlu0 %639  ;;  %2366 = vmatpush3.bf16.msra.mxu0 %v2450_v38 }
 0x201   : > { %v745_v3 = vsel %vm391_vm4, %v729_v63, %v640_v61  ;;  %2367 = vmatprep.subr.bf16.mxu0 %v2472_v27  ;;  %v2949_v61 = vshrl.u32 %v269_v21, 7  ;;  %v819_v63 = vld [vmem:[%s3203_s3] sm:$0x7] }
 0x202   : > { %v694_v1 = vpop.permute.xlu1 %693  ;;  %1073 = vmatmul.mubr.bf16.gmra.mrb[8].mxu1 %v762_v62  ;;  %1182 = vmatmul.mubr.bf16.gmra.mrb[24].mxu0 %v762_v62 }
 0x203   : > { %2252 = vmatprep.mubr.msk.bf16.mxu1 %vm721_vm2, %v712_v4  ;;  %2260 = vmatprep.mubr.msk.bf16.mxu0 %vm721_vm2, %v712_v4  ;;  %v765_v7 = vsel %vm754_vm7, %v745_v3, %v694_v1  ;;  %v823_v62 = vsub.s32 0, %v2949_v61  ;;  %v831_v1 = vsub.s32 2, %v2949_v61  ;;  %v1280_v4 = vadd.s32 8, %v2949_v61 }
 0x204   : > { %v599_v2 = vpop.permute.xlu0 %598  ;;  %2368 = vmatpush3.bf16.msra.mxu0 %v2453_v52 }
 0x205   : > { %v731_v9 = vsel %vm721_vm2, %v2742_v24, %v599_v2  ;;  %2369 = vmatprep.subr.bf16.mxu0 %v2472_v27  ;;  %v827_v2 = vsub.s32 1, %v2949_v61  ;;  %v2959_v3 = vrot.slane %v819_v63, %v823_v62  ;;  %v2961_v5 = vrot.slane %v819_v63, %v831_v1 }
 0x206   : > { %v642_v6 = vpop.permute.xlu1 %641  ;;  %v1306_v21 = vand.u32 15, %v1280_v4  ;;  %v1294_v4 = vadd.s32 120, %v2949_v61 }
 0x207   : > { %v747_v10 = vsel %vm391_vm4, %v731_v9, %v642_v6  ;;  %v2963_v6 = vrot.slane %v819_v63, %v827_v2 }
 0x208   : > { %v696_v59 = vpop.permute.xlu0 %695  ;;  %2370 = vmatpush3.bf16.msra.mxu0 %v2456_v53  ;;  %vm1499_vm8 = vcmp.le.s32.totalorder %v1306_v21, 13  ;;  %vm1501_vm9 = vcmp.le.s32.totalorder %v1306_v21, 11  ;;  %vm1500_vm10 = vcmp.le.s32.totalorder %v1306_v21, 12 }
 0x209   : > { %v768_v14 = vsel %vm754_vm7, %v747_v10, %v696_v59  ;;  %2371 = vmatprep.subr.bf16.mxu0 %v2472_v27 }
 0x20a   : > { %1083 = vmatmul.mubr.bf16.gmra.mrb[12].mxu1 %v765_v7  ;;  %1190 = vmatmul.mubr.bf16.gmra.mrb[28].mxu0 %v765_v7  ;;  %v601_v11 = vpop.permute.xlu1 %600 }
 0x20b   : > { %2253 = vmatprep.mubr.msk.bf16.mxu1 %vm721_vm2, %v714_v8  ;;  %2261 = vmatprep.mubr.msk.bf16.mxu0 %vm721_vm2, %v714_v8  ;;  %v733_v24 = vsel %vm721_vm2, %v2739_v19, %v601_v11 }
 0x20c   : > { %v644_v13 = vpop.permute.xlu0 %643  ;;  %2372 = vmatpush3.bf16.msra.mxu0 %v2459_v36 }
 0x20d   : > { %v749_v18 = vsel %vm391_vm4, %v733_v24, %v644_v13  ;;  %2373 = vmatprep.subr.bf16.mxu0 %v2472_v27 }
 0x20e   : > { %v698_v17 = vpop.permute.xlu1 %697 }
 0x20f   : > { %v771_v23 = vsel %vm754_vm7, %v749_v18, %v698_v17 }
 0x210   : > { %v603_v22 = vpop.permute.xlu0 %602  ;;  %2374 = vmatpush3.bf16.msra.mxu0 %v2462_v58 }
 0x211   : > { %v735_v19 = vsel %vm721_vm2, %v2758_v48, %v603_v22 }
 0x212   : > { %1093 = vmatmul.mubr.bf16.gmra.mrb[16].mxu1 %v768_v14  ;;  %1198 = vmatmul.mubr.bf16.gmra.mrb[32].mxu0 %v768_v14  ;;  %v646_v25 = vpop.permute.xlu1 %645 }
 0x213   : > { %2254 = vmatprep.mubr.msk.bf16.mxu1 %vm721_vm2, %v716_v16  ;;  %2262 = vmatprep.mubr.msk.bf16.mxu0 %vm721_vm2, %v716_v16  ;;  %v751_v29 = vsel %vm391_vm4, %v735_v19, %v646_v25  ;;  %v1286_v19 = vadd.s32 56, %v2949_v61 }
 0x214   : > { %v700_v28 = vpop.permute.xlu0 %699 }
 0x215   : > { %v774_v31 = vsel %vm754_vm7, %v751_v29, %v700_v28  ;;  %v1288_v28 = vadd.s32 72, %v2949_v61 }
 0x216   : > { %v605_v30 = vpop.permute.xlu1 %604 }
 0x217   : > { %v737_v33 = vsel %vm721_vm2, %v2754_v44, %v605_v30  ;;  %v2440_v44 = vld [vmem:[%s3204_s4] sm:$0xff]  }
 0x218   : > { %v648_v35 = vpop.permute.xlu0 %647  ;;  %2305 = vmatpush3.bf16.msra.mxu1 %v2440_v44 }
 0x219   : > { %v753_v48 = vsel %vm391_vm4, %v737_v33, %v648_v35  ;;  %2306 = vmatprep.subr.bf16.mxu1 %v2442_v41  ;;  %vm2476_vm4 = vmmov 0  }
 0x21a   : > { %1103 = vmatmul.mubr.bf16.gmra.mrb[20].mxu1 %v771_v23  ;;  %1206 = vmatmul.mubr.bf16.gmra.mrb[36].mxu0 %v771_v23  ;;  %v702_v37 = vpop.permute.xlu1 %701  ;;  %v1284_v23 = vadd.s32 40, %v2949_v61 }
 0x21b   : > { %2255 = vmatprep.mubr.msk.bf16.mxu1 %vm721_vm2, %v718_v26  ;;  %2263 = vmatprep.mubr.msk.bf16.mxu0 %vm721_vm2, %v718_v26  ;;  %v777_v39 = vsel %vm754_vm7, %v753_v48, %v702_v37  ;;  %v1292_v37 = vadd.s32 104, %v2949_v61 }
 0x21c   : > { %2307 = vmatpush3.bf16.msra.mxu1 %v2443_v0  ;;  %v2984_v0 = vand.u32 15, %v1284_v23 }
 0x21d   : > { %2308 = vmatprep.subr.bf16.mxu1 %v2445_v43  ;;  %v2996_v58 = vand.u32 15, %v1292_v37 }
 0x21e   : > { %vm1511_vm14 = vcmp.le.s32.totalorder %v2984_v0, 13  ;;  %vm1513_vm15 = vcmp.le.s32.totalorder %v2984_v0, 11  ;;  %vm1512_vm0 = vcmp.le.s32.totalorder %v2984_v0, 12 }
 0x220   : > { %2309 = vmatpush3.bf16.msra.mxu1 %v2446_v45 }
 0x221   : > { %2310 = vmatprep.subr.bf16.mxu1 %v2448_v47  ;;  %v2987_v47 = vand.u32 15, %v1286_v19 }
 0x222   : > { %1113 = vmatmul.mubr.bf16.gmra.mrb[24].mxu1 %v774_v31  ;;  %1214 = vmatmul.mubr.bf16.gmra.mrb[40].mxu0 %v774_v31 }
 0x223   : > { %2256 = vmatprep.mubr.msk.bf16.mxu1 %vm721_vm2, %v720_v32  ;;  %2264 = vmatprep.mubr.msk.bf16.mxu0 %vm721_vm2, %v720_v32  ;;  %v1290_v32 = vadd.s32 88, %v2949_v61  ;;  %vm1517_vm2 = vcmp.le.s32.totalorder %v2987_v47, 13  ;;  %vm1519_vm3 = vcmp.le.s32.totalorder %v2987_v47, 11  ;;  %vm1518_vm5 = vcmp.le.s32.totalorder %v2987_v47, 12 }
 0x224   : > { %2311 = vmatpush3.bf16.msra.mxu1 %v2449_v49  ;;  %v2989_v49 = vand.u32 15, %v1288_v28 }
 0x225   : > { %2312 = vmatprep.subr.bf16.mxu1 %v2451_v50 }
 0x226   : > { %vm1523_vm7 = vcmp.le.s32.totalorder %v2989_v49, 13 }
 0x228   : > { %2313 = vmatpush3.bf16.msra.mxu1 %v2452_v51 }
 0x229   : > { %2314 = vmatprep.subr.bf16.mxu1 %v2454_v54  ;;  %v2992_v54 = vand.u32 15, %v1290_v32 }
 0x22a   : > { %1123 = vmatmul.mubr.bf16.gmra.mrb[28].mxu1 %v777_v39  ;;  %1222 = vmatmul.mubr.bf16.gmra.mrb[44].mxu0 %v777_v39 }
 0x22b   : > { %2375 = vmatprep.mubr.msk.bf16.mxu0 %vm2476_vm4, %v2472_v27  ;;  %v1282_v27 = vadd.s32 24, %v2949_v61  ;;  %vm1525_vm4 = vcmp.le.s32.totalorder %v2989_v49, 11 }
 0x22c   : > { %2315 = vmatpush3.bf16.msra.mxu1 %v2455_v55 }
 0x22d   : > { %2316 = vmatprep.subr.bf16.mxu1 %v2457_v56  ;;  %v2965_v9 = vand.u32 15, %v1282_v27 }
 0x22f   : > { %vm1505_vm11 = vcmp.le.s32.totalorder %v2965_v9, 13  ;;  %vm1507_vm12 = vcmp.le.s32.totalorder %v2965_v9, 11  ;;  %vm1506_vm13 = vcmp.le.s32.totalorder %v2965_v9, 12  ;;  %v3011_v9 = vand.u32 15, %v1294_v4 }
 0x230   : > { %2317 = vmatpush3.bf16.msra.mxu1 %v2458_v15 }
 0x231   : > { %2318 = vmatprep.subr.bf16.mxu1 %v2460_v57 }
 0x234   : > { %2319 = vmatpush3.bf16.msra.mxu1 %v2461_v60 }
 0x2c5   : > { %v1054_v7 = vpop.f32.mrb[0].mxu1  ;;  %v1167_v8 = vpop.f32.mrb[16].mxu0 }
 0x2c6   : > { %v1056_v59 = vpop.f32.mrb[1].mxu1  ;;  %v1169_v10 = vpop.f32.mrb[17].mxu0  ;;  %v1055_v11 = vadd.f32 %v1054_v7, %v2959_v3  ;;  %v1168_v12 = vadd.f32 %v1167_v8, %v2961_v5 }
 0x2c7   : > { %v1058_v13 = vpop.f32.mrb[2].mxu1  ;;  %v1170_v14 = vpop.f32.mrb[18].mxu0  ;;  %v1057_v16 = vadd.f32 %v1056_v59, %v2963_v6 }
 0x2c8   : > { %v1059_v24 = vadd.f32 %v1058_v13, %v2959_v3  ;;  %v1171_v17 = vadd.f32 %v1170_v14, %v2961_v5  ;;  %v1060_v18 = vpop.f32.mrb[3].mxu1  ;;  %v1172_v20 = vpop.f32.mrb[19].mxu0  ;;  %v1230_v29 = vmax.f32 %v1055_v11, 0.0  ;;  %v1232_v30 = vmax.f32 %v1168_v12, 0.0 }
 0x2c9   : > { %v1061_v22 = vadd.f32 %v1060_v18, %v2963_v6  ;;  %v1231_v33 = vmax.f32 %v1057_v16, 0.0 }
 0x2ca   : > { %v1233_v25 = vmax.f32 %v1059_v24, 0.0  ;;  %v1235_v26 = vmax.f32 %v1171_v17, 0.0 }
 0x2cb   : > { %v1234_v31 = vmax.f32 %v1061_v22, 0.0 }
 0x2cc   : > { %v1547_v35 = vsel %vm1499_vm8, %v1233_v25, 0.0  ;;  %v1549_v48 = vsel %vm1501_vm9, %v1235_v26, 0.0  ;;  %vm1524_vm8 = vcmp.le.s32.totalorder %v2989_v49, 12  ;;  %vm1891_vm9 = vcmask 1043459  }
 0x2cd   : > { %v1592_v39 = vmax.f32 %v1230_v29, %v1547_v35  ;;  %v1606_v40 = vmax.f32 %v1232_v30, %v1549_v48  ;;  %v1548_v44 = vsel %vm1500_vm10, %v1234_v31, 0.0  ;;  %v1064_v34 = vpop.f32.mrb[4].mxu1  ;;  %v1175_v41 = vpop.f32.mrb[20].mxu0  ;;  %vm1529_vm10 = vcmp.le.s32.totalorder %v2992_v54, 13 }
 0x2ce   : > { %v1599_v42 = vmax.f32 %v1231_v33, %v1548_v44  ;;  %v1065_v43 = vadd.f32 %v1064_v34, %v2959_v3  ;;  %v1066_v45 = vpop.f32.mrb[5].mxu1  ;;  %v1177_v46 = vpop.f32.mrb[21].mxu0  ;;  %v1176_v51 = vadd.f32 %v1175_v41, %v2961_v5 }
 0x2cf   : > { %v1593_v38 = vrot.slane %v1592_v39, 4  ;;  %v1607_v50 = vrot.slane %v1606_v40, 4  ;;  %v1068_v52 = vpop.f32.mrb[6].mxu1  ;;  %v1178_v53 = vpop.f32.mrb[22].mxu0  ;;  %v1067_v36 = vadd.f32 %v1066_v45, %v2963_v6 }
 0x2d0   : > { %v1600_v55 = vrot.slane %v1599_v42, 4  ;;  %v1069_v56 = vadd.f32 %v1068_v52, %v2959_v3  ;;  %v1070_v15 = vpop.f32.mrb[7].mxu1  ;;  %v1180_v57 = vpop.f32.mrb[23].mxu0  ;;  %v1179_v1 = vadd.f32 %v1178_v53, %v2961_v5  ;;  %v1236_v2 = vmax.f32 %v1065_v43, 0.0 }
 0x2d1   : > { %v1594_v60 = vmax.f32 %v1592_v39, %v1593_v38  ;;  %v1608_v62 = vmax.f32 %v1606_v40, %v1607_v50  ;;  %v1071_v21 = vadd.f32 %v1070_v15, %v2963_v6  ;;  %v1238_v59 = vmax.f32 %v1176_v51, 0.0 }
 0x2d2   : > { %v1601_v63 = vmax.f32 %v1599_v42, %v1600_v55  ;;  %v1239_v27 = vmax.f32 %v1069_v56, 0.0  ;;  %v1241_v10 = vmax.f32 %v1179_v1, 0.0  ;;  %v1237_v12 = vmax.f32 %v1067_v36, 0.0 }
 0x2d3   : > { %v1595_v7 = vrot.slane %v1594_v60, 2  ;;  %v1609_v8 = vrot.slane %v1608_v62, 2  ;;  %v1240_v14 = vmax.f32 %v1071_v21, 0.0 }
 0x2d4   : > { %v1602_v11 = vrot.slane %v1601_v63, 2  ;;  %v1553_v13 = vsel %vm1505_vm11, %v1239_v27, 0.0  ;;  %v1555_v61 = vsel %vm1507_vm12, %v1241_v10, 0.0  ;;  %vm1531_vm11 = vcmp.le.s32.totalorder %v2992_v54, 11 }
 0x2d5   : > { %v1596_v16 = vmax.f32 %v1594_v60, %v1595_v7  ;;  %v1610_v24 = vmax.f32 %v1608_v62, %v1609_v8  ;;  %v1613_v17 = vmax.f32 %v1236_v2, %v1553_v13  ;;  %v1074_v18 = vpop.f32.mrb[8].mxu1  ;;  %v1183_v20 = vpop.f32.mrb[24].mxu0  ;;  %v1627_v23 = vmax.f32 %v1238_v59, %v1555_v61 }
 0x2d6   : > { %v1603_v22 = vmax.f32 %v1601_v63, %v1602_v11  ;;  %v1554_v25 = vsel %vm1506_vm13, %v1240_v14, 0.0  ;;  %v1075_v26 = vadd.f32 %v1074_v18, %v2959_v3  ;;  %v1076_v19 = vpop.f32.mrb[9].mxu1  ;;  %v1185_v28 = vpop.f32.mrb[25].mxu0  ;;  %v1184_v39 = vadd.f32 %v1183_v20, %v2961_v5 }
 0x2d7   : > { %v1597_v29 = vrot.slane %v1596_v16, 1  ;;  %v1611_v30 = vrot.slane %v1610_v24, 1  ;;  %v1614_v31 = vrot.slane %v1613_v17, 4  ;;  %v1620_v32 = vmax.f32 %v1237_v12, %v1554_v25  ;;  %v1078_v33 = vpop.f32.mrb[10].mxu1  ;;  %v1186_v35 = vpop.f32.mrb[26].mxu0 }
 0x2d8   : > { %v1604_v48 = vrot.slane %v1603_v22, 1  ;;  %v1628_v37 = vrot.slane %v1627_v23, 4  ;;  %v1080_v40 = vpop.f32.mrb[11].mxu1  ;;  %v1188_v44 = vpop.f32.mrb[27].mxu0  ;;  %v1242_v38 = vmax.f32 %v1075_v26, 0.0  ;;  %v1077_v50 = vadd.f32 %v1076_v19, %v2963_v6 }
 0x2d9   : > { %v1598_v34 = vmax.f32 %v1596_v16, %v1597_v29  ;;  %v1612_v41 = vmax.f32 %v1610_v24, %v1611_v30  ;;  %v1615_v42 = vmax.f32 %v1613_v17, %v1614_v31  ;;  %v1621_v43 = vrot.slane %v1620_v32, 4 }
 0x2da   : > { %v1605_v45 = vmax.f32 %v1603_v22, %v1604_v48  ;;  %v1629_v46 = vmax.f32 %v1627_v23, %v1628_v37  ;;  %v1244_v15 = vmax.f32 %v1184_v39, 0.0  ;;  %v1079_v57 = vadd.f32 %v1078_v33, %v2959_v3 }
 0x2db   : > { %v1760_v51 = vpack.c.bf16 %v1598_v34, %v1598_v34  ;;  %v1762_v52 = vpack.c.bf16 %v1612_v41, %v1612_v41  ;;  %v1616_v53 = vrot.slane %v1615_v42, 2  ;;  %v1622_v55 = vmax.f32 %v1620_v32, %v1621_v43 }
 0x2dc   : > { %v1761_v36 = vpack.c.bf16 %v1605_v45, %v1605_v45  ;;  %v1630_v56 = vrot.slane %v1629_v46, 2  ;;  %v1243_v4 = vmax.f32 %v1077_v50, 0.0  ;;  %v1245_v7 = vmax.f32 %v1079_v57, 0.0 }
 0x2dd   : > { %v1863_v60 = vunpack.c.l.b16 %v1760_v51  ;;  %v1617_v62 = vmax.f32 %v1615_v42, %v1616_v53  ;;  %v1623_v1 = vrot.slane %v1622_v55, 2  ;;  %v1084_v63 = vpop.f32.mrb[12].mxu1  ;;  %v1191_v2 = vpop.f32.mrb[28].mxu0  ;;  %v1865_v27 = vunpack.c.l.b16 %v1762_v52 }
 0x2de   : > { %v1631_v21 = vmax.f32 %v1629_v46, %v1630_v56  ;;  %v1187_v8 = vadd.f32 %v1186_v35, %v2961_v5  ;;  %v1086_v59 = vpop.f32.mrb[13].mxu1  ;;  %v1193_v10 = vpop.f32.mrb[29].mxu0  ;;  %v1081_v13 = vadd.f32 %v1080_v40, %v2963_v6  ;;  %v1085_v14 = vadd.f32 %v1084_v63, %v2959_v3 }
 0x2df   : > { %v1618_v11 = vrot.slane %v1617_v62, 1  ;;  %v1624_v12 = vmax.f32 %v1622_v55, %v1623_v1  ;;  %v1088_v16 = vpop.f32.mrb[14].mxu1  ;;  %v1194_v24 = vpop.f32.mrb[30].mxu0  ;;  %v1559_v61 = vsel %vm1511_vm14, %v1245_v7, 0.0  ;;  %v3023_v20 = vadd.f32 %v1191_v2, %v2961_v5 }
 0x2e0   : > { %v1632_v17 = vrot.slane %v1631_v21, 1  ;;  %v1247_v18 = vmax.f32 %v1187_v8, 0.0  ;;  %v1090_v22 = vpop.f32.mrb[15].mxu1  ;;  %v1196_v23 = vpop.f32.mrb[31].mxu0  ;;  %v1634_v19 = vmax.f32 %v1242_v38, %v1559_v61  ;;  %v1246_v28 = vmax.f32 %v1081_v13, 0.0 }
 0x2e1   : > { %v1619_v25 = vmax.f32 %v1617_v62, %v1618_v11  ;;  %v1625_v26 = vrot.slane %v1624_v12, 1  ;;  %v1864_v29 = vunpack.c.l.b16 %v1761_v36  ;;  %v1248_v32 = vmax.f32 %v1085_v14, 0.0 }
 0x2e2   : > { %v1633_v30 = vmax.f32 %v1631_v21, %v1632_v17  ;;  %v1561_v31 = vsel %vm1513_vm15, %v1247_v18, 0.0  ;;  %v1635_v48 = vrot.slane %v1634_v19, 4  ;;  %v1560_v40 = vsel %vm1512_vm0, %v1246_v28, 0.0 }
 0x2e3   : > { %v1763_v33 = vpack.c.bf16 %v1619_v25, %v1619_v25  ;;  %v1626_v35 = vmax.f32 %v1624_v12, %v1625_v26  ;;  %v1648_v37 = vmax.f32 %v1244_v15, %v1561_v31  ;;  %v1250_v44 = vmax.f32 %v3023_v20, 0.0 }
 0x2e4   : > { %v1765_v39 = vpack.c.bf16 %v1633_v30, %v1633_v30  ;;  %v1089_v34 = vadd.f32 %v1088_v16, %v2959_v3  ;;  %v1636_v43 = vmax.f32 %v1634_v19, %v1635_v48  ;;  %v1641_v51 = vmax.f32 %v1243_v4, %v1560_v40 }
 0x2e5   : > { %v1866_v41 = vunpack.c.l.b16 %v1763_v33  ;;  %v1764_v42 = vpack.c.bf16 %v1626_v35, %v1626_v35  ;;  %v1649_v45 = vrot.slane %v1648_v37, 4  ;;  %v1094_v46 = vpop.f32.mrb[16].mxu1  ;;  %v1199_v38 = vpop.f32.mrb[32].mxu0  ;;  %v1087_v52 = vadd.f32 %v1086_v59, %v2963_v6 }
 0x2e6   : > { %v1868_v50 = vunpack.c.l.b16 %v1765_v39  ;;  %v1251_v53 = vmax.f32 %v1089_v34, 0.0  ;;  %v1096_v55 = vpop.f32.mrb[17].mxu1  ;;  %v1201_v36 = vpop.f32.mrb[33].mxu0  ;;  %v1637_v15 = vrot.slane %v1636_v43, 2  ;;  %v1642_v2 = vrot.slane %v1641_v51, 4 }
 0x2e7   : > { %v3035_v0 = vsel %vm1887_vm1, %v1866_v41, %v1863_v60  ;;  %v1867_v56 = vunpack.c.l.b16 %v1764_v42  ;;  %v1650_v57 = vmax.f32 %v1648_v37, %v1649_v45  ;;  %v1098_v62 = vpop.f32.mrb[18].mxu1  ;;  %v1202_v1 = vpop.f32.mrb[34].mxu0  ;;  %v1195_v21 = vadd.f32 %v1194_v24, %v2961_v5 }
 0x2e8   : > { %v3038_v63 = vsel %vm1887_vm1, %v1868_v50, %v1865_v27  ;;  %v1565_v4 = vsel %vm1517_vm2, %v1251_v53, 0.0  ;;  %v3043_v7 = vpop.f32.mrb[19].mxu1  ;;  %v1204_v8 = vpop.f32.mrb[35].mxu0  ;;  %v1638_v59 = vmax.f32 %v1636_v43, %v1637_v15  ;;  %v1643_v27 = vmax.f32 %v1641_v51, %v1642_v2 }
 0x2e9   : > { %v3046_v60 = vsel %vm1887_vm1, %v1867_v56, %v1864_v29  ;;  %v1651_v10 = vrot.slane %v1650_v57, 2  ;;  %v1655_v11 = vmax.f32 %v1248_v32, %v1565_v4  ;;  %v1253_v12 = vmax.f32 %v1195_v21, 0.0 }
 0x2ea   : > { %v1091_v13 = vadd.f32 %v1090_v22, %v2963_v6  ;;  %v1095_v14 = vadd.f32 %v1094_v46, %v2959_v3  ;;  %v1639_v16 = vrot.slane %v1638_v59, 1  ;;  %v3052_v61 = vadd.f32 %v1199_v38, %v2961_v5 }
 0x2eb   : > { %v1652_v17 = vmax.f32 %v1650_v57, %v1651_v10  ;;  %v1656_v24 = vrot.slane %v1655_v11, 4  ;;  %v1644_v18 = vrot.slane %v1643_v27, 2  ;;  %v1249_v20 = vmax.f32 %v1087_v52, 0.0 }
 0x2ec   : > { %v1567_v23 = vsel %vm1519_vm3, %v1253_v12, 0.0  ;;  %v1252_v25 = vmax.f32 %v1091_v13, 0.0  ;;  %v1640_v26 = vmax.f32 %v1638_v59, %v1639_v16  ;;  %v1254_v33 = vmax.f32 %v1095_v14, 0.0 }
 0x2ed   : > { %v1653_v19 = vrot.slane %v1652_v17, 1  ;;  %v1657_v28 = vmax.f32 %v1655_v11, %v1656_v24  ;;  %v1669_v22 = vmax.f32 %v1250_v44, %v1567_v23  ;;  %v1104_v29 = vpop.f32.mrb[20].mxu1  ;;  %v3057_v30 = vpop.f32.mrb[36].mxu0  ;;  %v1645_v31 = vmax.f32 %v1643_v27, %v1644_v18 }
 0x2ee   : > { %v1566_v32 = vsel %vm1518_vm5, %v1252_v25, 0.0  ;;  %v1256_v35 = vmax.f32 %v3052_v61, 0.0  ;;  %v3062_v48 = vpop.f32.mrb[21].mxu1  ;;  %v1209_v37 = vpop.f32.mrb[37].mxu0  ;;  %v1766_v39 = vpack.c.bf16 %v1640_v26, %v1640_v26  ;;  %v1097_v45 = vadd.f32 %v1096_v55, %v2963_v6 }
 0x2ef   : > { %v1654_v40 = vmax.f32 %v1652_v17, %v1653_v19  ;;  %v1658_v34 = vrot.slane %v1657_v28, 2  ;;  %v1670_v41 = vrot.slane %v1669_v22, 4  ;;  %v3065_v44 = vpop.f32.mrb[22].mxu1  ;;  %v3067_v42 = vpop.f32.mrb[38].mxu0  ;;  %v1646_v43 = vrot.slane %v1645_v31, 1 }
 0x2f0   : > { %v1662_v47 = vmax.f32 %v1249_v20, %v1566_v32  ;;  %v1099_v46 = vadd.f32 %v1098_v62, %v2959_v3  ;;  %v3071_v38 = vpop.f32.mrb[23].mxu1  ;;  %v1212_v50 = vpop.f32.mrb[39].mxu0  ;;  %v1869_v51 = vunpack.c.l.b16 %v1766_v39  ;;  %v1203_v2 = vadd.f32 %v1202_v1, %v2961_v5 }
 0x2f1   : > { %v1768_v52 = vpack.c.bf16 %v1654_v40, %v1654_v40  ;;  %v1659_v53 = vmax.f32 %v1657_v28, %v1658_v34  ;;  %v1671_v36 = vmax.f32 %v1669_v22, %v1670_v41  ;;  %v1647_v56 = vmax.f32 %v1645_v31, %v1646_v43 }
 0x2f2   : > { %v1663_v15 = vrot.slane %v1662_v47, 4  ;;  %v1257_v57 = vmax.f32 %v1099_v46, 0.0  ;;  %v1890_v4 = vsel %vm1889_vm6, %v1869_v51, %v3035_v0  ;;  %v1259_v11 = vmax.f32 %v1203_v2, 0.0 }
 0x2f3   : > { %v1871_v21 = vunpack.c.l.b16 %v1768_v52  ;;  %v1660_v8 = vrot.slane %v1659_v53, 1  ;;  %v1672_v55 = vrot.slane %v1671_v36, 2  ;;  %v1767_v59 = vpack.c.bf16 %v1647_v56, %v1647_v56 }
 0x2f4   : > { %v1664_v62 = vmax.f32 %v1662_v47, %v1663_v15  ;;  %v1571_v10 = vsel %vm1523_vm7, %v1257_v57, 0.0  ;;  %v1255_v17 = vmax.f32 %v1097_v45, 0.0  ;;  %v1573_v24 = vsel %vm1525_vm4, %v1259_v11, 0.0 }
 0x2f5   : > { %v1909_v27 = vsel %vm1889_vm6, %v1871_v21, %v3038_v63  ;;  %v1661_v12 = vmax.f32 %v1659_v53, %v1660_v8  ;;  %v1673_v13 = vmax.f32 %v1671_v36, %v1672_v55  ;;  %v1676_v14 = vmax.f32 %v1254_v33, %v1571_v10  ;;  %v3081_v1 = vpop.f32.mrb[24].mxu1  ;;  %v3083_v0 = vpop.f32.mrb[40].mxu0 }
 0x2f6   : > { %v1665_v16 = vrot.slane %v1664_v62, 2  ;;  %v1101_v61 = vadd.f32 %v3043_v7, %v2963_v6  ;;  %v3090_v63 = vpop.f32.mrb[25].mxu1  ;;  %v1217_v18 = vpop.f32.mrb[41].mxu0  ;;  %v1690_v26 = vmax.f32 %v1256_v35, %v1573_v24  ;;  %v3096_v22 = vunpack.c.l.b16 %v1767_v59 }
 0x2f7   : > { %v1769_v20 = vpack.c.bf16 %v1661_v12, %v1661_v12  ;;  %v1674_v23 = vrot.slane %v1673_v13, 1  ;;  %v1677_v25 = vrot.slane %v1676_v14, 4  ;;  %v3092_v19 = vpop.f32.mrb[26].mxu1  ;;  %v3094_v28 = vpop.f32.mrb[42].mxu0  ;;  %v1105_v33 = vadd.f32 %v1104_v29, %v2959_v3 }
 0x2f8   : > { %v1666_v31 = vmax.f32 %v1664_v62, %v1665_v16  ;;  %v1258_v32 = vmax.f32 %v1101_v61, 0.0  ;;  %v3099_v7 = vpop.f32.mrb[27].mxu1  ;;  %v1220_v37 = vpop.f32.mrb[43].mxu0  ;;  %v1691_v41 = vrot.slane %v1690_v26, 4  ;;  %vm1530_vm12 = vcmp.le.s32.totalorder %v2992_v54, 12 }
 0x2f9   : > { %v1872_v39 = vunpack.c.l.b16 %v1769_v20  ;;  %v1675_v40 = vmax.f32 %v1673_v13, %v1674_v23  ;;  %v1678_v34 = vmax.f32 %v1676_v14, %v1677_v25  ;;  %v1260_v47 = vmax.f32 %v1105_v33, 0.0 }
 0x2fa   : > { %v1667_v35 = vrot.slane %v1666_v31, 1  ;;  %v1572_v43 = vsel %vm1524_vm8, %v1258_v32, 0.0  ;;  %v1208_v45 = vadd.f32 %v3057_v30, %v2961_v5  ;;  %v1692_v51 = vmax.f32 %v1690_v26, %v1691_v41 }
 0x2fb   : > { %v1892_v46 = vsel %vm1891_vm9, %v1872_v39, %v1890_v4  ;;  %v1771_v29 = vpack.c.bf16 %v1675_v40, %v1675_v40  ;;  %v1679_v50 = vrot.slane %v1678_v34, 2  ;;  %vm1893_vm13 = vcmask 1044484  }
 0x2fc   : > { %v1668_v52 = vmax.f32 %v1666_v31, %v1667_v35  ;;  %v1683_v53 = vmax.f32 %v1255_v17, %v1572_v43  ;;  %v1107_v36 = vadd.f32 %v3062_v48, %v2963_v6  ;;  %v1109_v56 = vadd.f32 %v3065_v44, %v2959_v3 }
 0x2fd   : > { %v1874_v49 = vunpack.c.l.b16 %v1771_v29  ;;  %v1680_v15 = vmax.f32 %v1678_v34, %v1679_v50  ;;  %v1693_v57 = vrot.slane %v1692_v51, 2  ;;  %v1211_v30 = vadd.f32 %v3067_v42, %v2961_v5  ;;  %v3113_v2 = vpop.f32.mrb[28].mxu1  ;;  %v3115_v4 = vpop.f32.mrb[44].mxu0 }
 0x2fe   : > { %v1770_v21 = vpack.c.bf16 %v1668_v52, %v1668_v52  ;;  %v1684_v8 = vrot.slane %v1683_v53, 4  ;;  %v1262_v55 = vmax.f32 %v1208_v45, 0.0  ;;  %v1263_v59 = vmax.f32 %v1109_v56, 0.0  ;;  %v3117_v62 = vpop.f32.mrb[29].mxu1  ;;  %v1225_v48 = vpop.f32.mrb[45].mxu0 }
 0x2ff   : > { %v1910_v10 = vsel %vm1891_vm9, %v1874_v49, %v1909_v27  ;;  %v1681_v44 = vrot.slane %v1680_v15, 1  ;;  %v1694_v11 = vmax.f32 %v1692_v51, %v1693_v57  ;;  %v1265_v12 = vmax.f32 %v1211_v30, 0.0  ;;  %v3120_v13 = vpop.f32.mrb[30].mxu1  ;;  %v3122_v14 = vpop.f32.mrb[46].mxu0 }
 0x300   : > { %v1685_v42 = vmax.f32 %v1683_v53, %v1684_v8  ;;  %v1261_v16 = vmax.f32 %v1107_v36, 0.0  ;;  %v1577_v17 = vsel %vm1529_vm10, %v1263_v59, 0.0  ;;  %v1111_v24 = vadd.f32 %v3071_v38, %v2963_v6  ;;  %v3128_v61 = vpop.f32.mrb[31].mxu1  ;;  %v1228_v18 = vpop.f32.mrb[47].mxu0 }
 0x301   : > { %v1682_v20 = vmax.f32 %v1680_v15, %v1681_v44  ;;  %v1695_v27 = vrot.slane %v1694_v11, 1  ;;  %v1697_v23 = vmax.f32 %v1260_v47, %v1577_v17  ;;  %v1579_v25 = vsel %vm1531_vm11, %v1265_v12, 0.0 }
 0x302   : > { %vm1535_vm14 = vcmp.le.s32.totalorder %v2996_v58, 13  ;;  %v1686_v26 = vrot.slane %v1685_v42, 2  ;;  %v1711_v31 = vmax.f32 %v1262_v55, %v1579_v25  ;;  %v1264_v32 = vmax.f32 %v1111_v24, 0.0 }
 0x303   : > { %v1115_v33 = vadd.f32 %v3081_v1, %v2959_v3  ;;  %vm1537_vm15 = vcmp.le.s32.totalorder %v2996_v58, 11  ;;  %v3136_v38 = vunpack.c.l.b16 %v1770_v21  ;;  %v1772_v37 = vpack.c.bf16 %v1682_v20, %v1682_v20 }
 0x304   : > { %v1696_v39 = vmax.f32 %v1694_v11, %v1695_v27  ;;  %v1698_v40 = vrot.slane %v1697_v23, 4  ;;  %vm1536_vm0 = vcmp.le.s32.totalorder %v2996_v58, 12  ;;  %v1687_v34 = vmax.f32 %v1685_v42, %v1686_v26 }
 0x305   : > { %v1712_v41 = vrot.slane %v1711_v31, 4  ;;  %v1578_v35 = vsel %vm1530_vm12, %v1264_v32, 0.0  ;;  %v1216_v43 = vadd.f32 %v3083_v0, %v2961_v5  ;;  %v1875_v47 = vunpack.c.l.b16 %v1772_v37 }
 0x306   : > { %v1774_v45 = vpack.c.bf16 %v1696_v39, %v1696_v39  ;;  %v1699_v1 = vmax.f32 %v1697_v23, %v1698_v40  ;;  %v1704_v29 = vmax.f32 %v1261_v16, %v1578_v35  ;;  %v1688_v50 = vrot.slane %v1687_v34, 1 }
 0x307   : > { %v1713_v51 = vmax.f32 %v1711_v31, %v1712_v41  ;;  %v1266_v52 = vmax.f32 %v1115_v33, 0.0  ;;  %v1117_v53 = vadd.f32 %v3090_v63, %v2963_v6  ;;  %v1894_v36 = vsel %vm1893_vm13, %v1875_v47, %v1892_v46 }
 0x308   : > { %v1877_v56 = vunpack.c.l.b16 %v1774_v45  ;;  %v1700_v49 = vrot.slane %v1699_v1, 2  ;;  %v1705_v15 = vrot.slane %v1704_v29, 4  ;;  %v1689_v54 = vmax.f32 %v1687_v34, %v1688_v50 }
 0x309   : > { %vm1895_vm1 = vcmask 1045509   ;;  %v1714_v57 = vrot.slane %v1713_v51, 2  ;;  %v1268_v30 = vmax.f32 %v1216_v43, 0.0  ;;  %v1119_v0 = vadd.f32 %v3092_v19, %v2959_v3 }
 0x30a   : > { %v1911_v21 = vsel %vm1893_vm13, %v1877_v56, %v1910_v10  ;;  %v1701_v8 = vmax.f32 %v1699_v1, %v1700_v49  ;;  %v1706_v55 = vmax.f32 %v1704_v29, %v1705_v15  ;;  %v1219_v59 = vadd.f32 %v3094_v28, %v2961_v5 }
 0x30b   : > { %v1773_v63 = vpack.c.bf16 %v1689_v54, %v1689_v54  ;;  %v1715_v48 = vmax.f32 %v1713_v51, %v1714_v57  ;;  %v1269_v46 = vmax.f32 %v1119_v0, 0.0  ;;  %v1121_v44 = vadd.f32 %v3099_v7, %v2963_v6 }
 0x30c   : > { %v1702_v11 = vrot.slane %v1701_v8, 1  ;;  %v1707_v12 = vrot.slane %v1706_v55, 2  ;;  %v1267_v42 = vmax.f32 %v1117_v53, 0.0  ;;  %v1271_v16 = vmax.f32 %v1219_v59, 0.0 }
 0x30d   : > { %v1716_v17 = vrot.slane %v1715_v48, 1  ;;  %v1583_v19 = vsel %vm1535_vm14, %v1269_v46, 0.0  ;;  %v1270_v10 = vmax.f32 %v1121_v44, 0.0  ;;  %v1125_v24 = vadd.f32 %v3113_v2, %v2959_v3 }
 0x30e   : > { %v1703_v18 = vmax.f32 %v1701_v8, %v1702_v11  ;;  %v1708_v28 = vmax.f32 %v1706_v55, %v1707_v12  ;;  %v1718_v20 = vmax.f32 %v1266_v52, %v1583_v19  ;;  %v1585_v27 = vsel %vm1537_vm15, %v1271_v16, 0.0 }
 0x30f   : > { %vm1541_vm2 = vcmp.le.s32.totalorder %v3011_v9, 13  ;;  %vm1543_vm3 = vcmp.le.s32.totalorder %v3011_v9, 11  ;;  %v1876_v7 = vunpack.c.l.b16 %v1773_v63  ;;  %v1717_v23 = vmax.f32 %v1715_v48, %v1716_v17 }
 0x310   : > { %v1732_v25 = vmax.f32 %v1268_v30, %v1585_v27  ;;  %v1584_v26 = vsel %vm1536_vm0, %v1270_v10, 0.0  ;;  %v1775_v31 = vpack.c.bf16 %v1703_v18, %v1703_v18  ;;  %v1709_v32 = vrot.slane %v1708_v28, 1 }
 0x311   : > { %v1719_v33 = vrot.slane %v1718_v20, 4  ;;  %v1725_v2 = vmax.f32 %v1267_v42, %v1584_v26  ;;  %vm1542_vm5 = vcmp.le.s32.totalorder %v3011_v9, 12  ;;  %v1777_v37 = vpack.c.bf16 %v1717_v23, %v1717_v23 }
 0x312   : > { %v1733_v39 = vrot.slane %v1732_v25, 4  ;;  %v1272_v40 = vmax.f32 %v1125_v24, 0.0  ;;  %v1224_v34 = vadd.f32 %v3115_v4, %v2961_v5  ;;  %v1878_v41 = vunpack.c.l.b16 %v1775_v31 }
 0x313   : > { %v1710_v35 = vmax.f32 %v1708_v28, %v1709_v32  ;;  %v1720_v43 = vmax.f32 %v1718_v20, %v1719_v33  ;;  %v1726_v47 = vrot.slane %v1725_v2, 4  ;;  %v1880_v45 = vunpack.c.l.b16 %v1777_v37 }
 0x314   : > { %v1734_v1 = vmax.f32 %v1732_v25, %v1733_v39  ;;  %v1274_v58 = vmax.f32 %v1224_v34, 0.0  ;;  %v1127_v29 = vadd.f32 %v3117_v62, %v2963_v6  ;;  %v1896_v50 = vsel %vm1895_vm1, %v1878_v41, %v1894_v36 }
 0x315   : > { %v1776_v51 = vpack.c.bf16 %v1710_v35, %v1710_v35  ;;  %v1721_v52 = vrot.slane %v1720_v43, 2  ;;  %v1727_v53 = vmax.f32 %v1725_v2, %v1726_v47  ;;  %v1912_v56 = vsel %vm1895_vm1, %v1880_v45, %v1911_v21 }
 0x316   : > { %v1735_v49 = vrot.slane %v1734_v1, 2  ;;  %v1129_v4 = vadd.f32 %v3120_v13, %v2959_v3  ;;  %v1227_v15 = vadd.f32 %v3122_v14, %v2961_v5  ;;  %v1131_v62 = vadd.f32 %v3128_v61, %v2963_v6 }
 0x317   : > { %v1879_v54 = vunpack.c.l.b16 %v1776_v51  ;;  %v1722_v57 = vmax.f32 %v1720_v43, %v1721_v52  ;;  %v1728_v30 = vrot.slane %v1727_v53, 2  ;;  %v1902_v21 = vsel %vm1889_vm6, %v3096_v22, %v3046_v60 }
 0x318   : > { %v1736_v0 = vmax.f32 %v1734_v1, %v1735_v49  ;;  %v1275_v36 = vmax.f32 %v1129_v4, 0.0  ;;  %v1277_v8 = vmax.f32 %v1227_v15, 0.0  ;;  %v1276_v63 = vmax.f32 %v1131_v62, 0.0 }
 0x319   : > { %v1723_v55 = vrot.slane %v1722_v57, 1  ;;  %v1729_v59 = vmax.f32 %v1727_v53, %v1728_v30  ;;  %v1903_v3 = vsel %vm1891_vm9, %v3136_v38, %v1902_v21  ;;  %v1273_v22 = vmax.f32 %v1127_v29, 0.0 }
 0x31a   : > { %v1737_v5 = vrot.slane %v1736_v0, 1  ;;  %v1589_v13 = vsel %vm1541_vm2, %v1275_v36, 0.0  ;;  %v1591_v6 = vsel %vm1543_vm3, %v1277_v8, 0.0  ;;  %v1904_v14 = vsel %vm1893_vm13, %v1876_v7, %v1903_v3  ;;  %v2265_v8 = vld [vmem:[%s3205_s5] ss:$0 sm:$0xff] }
 0x31b   : > { %v1724_v61 = vmax.f32 %v1722_v57, %v1723_v55  ;;  %v1730_v48 = vrot.slane %v1729_v59, 1  ;;  %v1739_v46 = vmax.f32 %v1272_v40, %v1589_v13  ;;  %v1753_v44 = vmax.f32 %v1274_v58, %v1591_v6 }
 0x31c   : > { %v1738_v60 = vmax.f32 %v1736_v0, %v1737_v5  ;;  %v1590_v11 = vsel %vm1542_vm5, %v1276_v63, 0.0  ;;  %v1905_v38 = vsel %vm1895_vm1, %v1879_v54, %v1904_v14  ;;  %vm1897_vm6 = vcmask 1046534  }
 0x31d   : > { %v1778_v12 = vpack.c.bf16 %v1724_v61, %v1724_v61  ;;  %v1731_v42 = vmax.f32 %v1729_v59, %v1730_v48  ;;  %v1740_v16 = vrot.slane %v1739_v46, 4  ;;  %v1754_v17 = vrot.slane %v1753_v44, 4 }
 0x31e   : > { %v1780_v19 = vpack.c.bf16 %v1738_v60, %v1738_v60  ;;  %v1746_v10 = vmax.f32 %v1273_v22, %v1590_v11  ;;  %vm1899_vm7 = vcmask 1047559  }
 0x31f   : > { %v1881_v24 = vunpack.c.l.b16 %v1778_v12  ;;  %v1779_v18 = vpack.c.bf16 %v1731_v42, %v1731_v42  ;;  %v1741_v28 = vmax.f32 %v1739_v46, %v1740_v16  ;;  %v1755_v20 = vmax.f32 %v1753_v44, %v1754_v17 }
 0x320   : > { %v1883_v27 = vunpack.c.l.b16 %v1780_v19  ;;  %v1747_v7 = vrot.slane %v1746_v10, 4 }
 0x321   : > { %v1742_v23 = vrot.slane %v1741_v28, 2  ;;  %v1756_v25 = vrot.slane %v1755_v20, 2  ;;  %v1882_v26 = vunpack.c.l.b16 %v1779_v18  ;;  %v1898_v9 = vsel %vm1897_vm6, %v1881_v24, %v1896_v50 }
 0x322   : > { %v1748_v31 = vmax.f32 %v1746_v10, %v1747_v7  ;;  %v1913_v32 = vsel %vm1897_vm6, %v1883_v27, %v1912_v56 }
 0x323   : > { %v1743_v33 = vmax.f32 %v1741_v28, %v1742_v23  ;;  %v1757_v2 = vmax.f32 %v1755_v20, %v1756_v25  ;;  %v1906_v37 = vsel %vm1897_vm6, %v1882_v26, %v1905_v38 }
 0x324   : > { %v1749_v39 = vrot.slane %v1748_v31, 2 }
 0x325   : > { %v1744_v40 = vrot.slane %v1743_v33, 1  ;;  %v1758_v34 = vrot.slane %v1757_v2, 1 }
 0x326   : > { %v1750_v41 = vmax.f32 %v1748_v31, %v1749_v39 }
 0x327   : > { %v1745_v35 = vmax.f32 %v1743_v33, %v1744_v40  ;;  %v1759_v43 = vmax.f32 %v1757_v2, %v1758_v34 }
 0x328   : > { %v1751_v47 = vrot.slane %v1750_v41, 1 }
 0x329   : > { %v1781_v45 = vpack.c.bf16 %v1745_v35, %v1745_v35  ;;  %v1783_v1 = vpack.c.bf16 %v1759_v43, %v1759_v43 }
 0x32a   : > { %v1752_v58 = vmax.f32 %v1750_v41, %v1751_v47 }
 0x32b   : > { %v1884_v29 = vunpack.c.l.b16 %v1781_v45  ;;  %v1886_v51 = vunpack.c.l.b16 %v1783_v1 }
 0x32c   : > { %v1782_v50 = vpack.c.bf16 %v1752_v58, %v1752_v58 }
 0x32d   : > { %v1914_v52 = vsel %vm1899_vm7, %v1886_v51, %v1913_v32  ;;  %v1900_v53 = vsel %vm1899_vm7, %v1884_v29, %v1898_v9 }
 0x32e   : > { %v1917_v56 = vpack.c.b16 %v1914_v52, %v1914_v52  ;;  %v1885_v49 = vunpack.c.l.b16 %v1782_v50  ;;  %v1915_v54 = vpack.c.b16 %v1900_v53, %v1900_v53 }
 0x330   : > { %2376 = vmatmul.mubr.bf16.vlgmr.msra.gmra.mrb[48].mxu0 %v1917_v56  ;;  %v1907_v4 = vsel %vm1899_vm7, %v1885_v49, %v1906_v37 }
 0x331   : > { %v1916_v15 = vpack.c.b16 %v1907_v4, %v1907_v4 }
 0x333   : > { %2097 = vmatprep.mubr.bf16.mxu1 %v1916_v15 }
 0x334   : > { %2098 = vmatmul.mubr.bf16.vlgmr.msra.gmra.mrb[32].mxu1 %v1915_v54 }
 0x403   : > { %v2139_v57 = vpop.f32.mrb[48].mxu0 }
 0x404   : > { %v2377_v30 = vpop.f32.mrb[49].mxu0 }
 0x405   : > { %v2142_v62 = vpop.f32.mrb[50].mxu0 }
 0x406   : > { %v2378_v0 = vpop.f32.mrb[51].mxu0 }
 0x407   : > { %v2320_v36 = vpop.f32.mrb[32].mxu1 }
 0x408   : > { %v2321_v21 = vpop.f32.mrb[33].mxu1 }
 0x409   : > { %v2322_v55 = vadd.f32 %v2321_v21, %v2320_v36  ;;  %v2323_v59 = vpop.f32.mrb[34].mxu1 }
 0x40a   : > { %v2324_v63 = vpop.f32.mrb[35].mxu1 }
 0x40b   : > { %v2100_v3 = vadd.f32 %v2322_v55, %v2265_v8 }
 0x40d   : > { %v2140_v5 = vadd.f32 %v2139_v57, %v2100_v3 }
 0x40f   : > { %2145 = vst [vmem:[%s251_s20] sm:$0xff] %v2140_v5 }
 0x410 PF: > { %s16_s21 = sadd.s32 1, %s2469_s21  }
 0x411   : > { %p13_p5 = scmp.ge.s32.totalorder %s16_s21, 4  }
 0x413   :  { %15 = sbr.rel (!%p13_p5) target bundleno = 1 (0x1), region = 74 }

</bundles_post_ra>
